<compile_context>
chip_gen: v6e
topology: v6e:2x2x1
jax: 0.10.0
libtpu: 0.0.40
codegen_flags: <defaults>
</compile_context>

<pallas_src>
import functools

import jax
import jax.numpy as jnp
from jax.experimental import pallas as pl
from jax.experimental.pallas import tpu as pltpu


def _round_up(x, m):
    return (x + m - 1) // m * m


def _explore_decoder_kernel(*refs, num_item, has_mask):
    if has_mask:
        (all_mem_ref, last_mem_ref, seq_ref, mask_ref,
         ue_w_ref, we_w_ref, web_ref, ve_w_ref,
         expl_ctx_ref, expl_last_ref, out_ref) = refs
    else:
        (all_mem_ref, last_mem_ref, seq_ref,
         ue_w_ref, we_w_ref, web_ref, ve_w_ref,
         expl_ctx_ref, expl_last_ref, out_ref) = refs
        mask_ref = None

    all_mem = all_mem_ref[...]                       # (TB, Sp, Hp) bf16
    last_mem = last_mem_ref[...]                     # (TB, Hp)     f32
    TB, Sp, Hp = all_mem.shape
    Np = out_ref.shape[-1]

    # ---- Ue(all_memory): bf16 MXU matmul, f32 accumulate ----------------------
    # Sp % 8 == 0 and Hp % 128 == 0 (wrapper pads), so the reshape is cheap.
    all_2d = all_mem.reshape(TB * Sp, Hp)
    all_p = jnp.dot(all_2d, ue_w_ref[...],
                    preferred_element_type=jnp.float32).reshape(TB, Sp, Hp)

    # ---- We(last_memory) + (we_b + ue_b): tiny f32 matmul ---------------------
    # ue_b is folded into we_b in the wrapper (removes a (TB, Sp, Hp) VPU add).
    last_p = (jnp.dot(last_mem, we_w_ref[...],
                      preferred_element_type=jnp.float32) + web_ref[...])

    # ---- tanh(Ue(all) + We(last)); activations stay in f32 (v5e-safe) ---------
    hidden = jnp.tanh(all_p + last_p[:, None, :])    # (TB, Sp, Hp)

    # ---- Ve: lane reduce over Hp.  Ve bias omitted: softmax over the sequence
    # axis is shift-invariant to a per-row scalar, so the output is identical.
    scores = jnp.sum(hidden * ve_w_ref[...][None, :, :], axis=-1)   # (TB, Sp)

    # ---- user mask and/or seq-padding mask (masked_fill with -1e9) ------------
    if has_mask:
        scores = jnp.where(mask_ref[...] != 0, jnp.float32(-1.0e9), scores)

    # ---- softmax over the sequence axis (EUP exp + approx reciprocal) ---------
    m = jnp.max(scores, axis=1, keepdims=True)
    e = jnp.exp(scores - m)
    attn = e * pl.reciprocal(jnp.sum(e, axis=1, keepdims=True), approx=True)

    # ---- attention-weighted sum of all_memory_values --------------------------
    # VPU multiply + XLU sublane reduce (M=1 batched matmuls are a bad fit for
    # the 256-wide MXU; these slots are otherwise idle in this region).
    ctx = jnp.sum(attn[:, :, None] * all_mem.astype(jnp.float32), axis=1)  # (TB, Hp)

    # ---- matrix_for_explore: two bf16 MXU dots (no lane-axis concat) ----------
    logits = (jnp.dot(ctx.astype(jnp.bfloat16), expl_ctx_ref[...],
                      preferred_element_type=jnp.float32)
              + jnp.dot(last_mem.astype(jnp.bfloat16), expl_last_ref[...],
                        preferred_element_type=jnp.float32))        # (TB, Np)

    # ---- explore mask: streaming (TB, Np) presence mask -----------------------
    # seq already carries a -1 sentinel for padding ids (wrapper), so the loop
    # body is a single compare + OR per position.  Padded item columns are
    # always killed.
    seq = seq_ref[...]                                              # (TB, Sp) i32
    col_ids = jax.lax.broadcasted_iota(jnp.int32, (TB, Np), 1)
    kill = col_ids >= num_item
    if Sp <= 32:
        # Short sequences: full static unroll (minimal per-iteration work).
        for s in range(Sp):
            kill = kill | (col_ids == seq[:, s:s + 1])
    else:
        # Long sequences: partially-unrolled fori_loop carrying the kill tile
        # and a lane-rotated copy of seq (bounds live ranges / vreg pressure).
        # TODO(synk): not exercised at the demo shapes (Sp <= 32 there).
        def body(_, carry):
            kill_i, seq_rot = carry
            hit = (col_ids == seq_rot[:, 0:1]).astype(jnp.int32)
            return kill_i | hit, pltpu.roll(seq_rot, shift=1, axis=1)
        kill_i, _ = jax.lax.fori_loop(0, Sp, body,
                                      (kill.astype(jnp.int32), seq), unroll=8)
        kill = kill_i != 0
    # NOTE: like the PyTorch reference, a row where *every* item is masked
    # would produce NaN (softmax over all -inf).
    logits = jnp.where(kill, jnp.float32(-jnp.inf), logits)

    # ---- softmax over items; exact reciprocal of the (TB,1) denominator -------
    mm = jnp.max(logits, axis=1, keepdims=True)
    ee = jnp.exp(logits - mm)
    out_ref[...] = ee * pl.reciprocal(jnp.sum(ee, axis=1, keepdims=True))


def _vmem_cap_bytes():
    """Generation-aware VMEM ceiling (~3/4 of physical VMEM)."""
    try:
        phys = int(pltpu.get_tpu_info().vmem_capacity_bytes)
    except Exception:
        phys = 64 << 20          # conservative fallback: assume v7x-sized VMEM
    return (phys * 3) // 4


def explore_recommendation_decoder(all_memory, last_memory, seq_item, params,
                                   mask=None, *, batch_tile=None):
    """Pallas wrapper. `params` follow PyTorch nn.Linear conventions (weight: out x in)."""
    B, S, H = all_memory.shape
    N = params["expl_w"].shape[0]

    # ---- static padding --------------------------------------------------------
    Sp = _round_up(S, 8)              # sublane multiple: cheap in-kernel reshapes
    Hp = _round_up(H, 128)            # lane-dense hidden dim (MXU + VPU)
    Np = _round_up(N, 128)            # lane-dense output stores
    if batch_tile is None:
        # Aim for >=2 batch tiles when possible (v7x has 2 TensorCores),
        # while keeping TB >= 8 (sublane-dense) and <= 128.
        target = _round_up(max(1, B // 2), 8) if B >= 16 else _round_up(B, 8)
        batch_tile = min(128, target)
    TB = max(8, _round_up(batch_tile, 8))
    Bp = _round_up(B, TB)

    # ---- inputs: bf16 for the dominant MXU operand, f32/i32 elsewhere ---------
    all_mem_p = jnp.pad(all_memory.astype(jnp.bfloat16),
                        ((0, Bp - B), (0, Sp - S), (0, Hp - H)))
    last_mem_p = jnp.pad(last_memory.astype(jnp.float32),
                         ((0, Bp - B), (0, Hp - H)))
    # -1 sentinel for padding ids (and padded positions): never matches a column
    # id, so the in-kernel kill loop needs no per-element (ids > 0) gate.
    seq_sent = jnp.where(seq_item > 0, seq_item.astype(jnp.int32), jnp.int32(-1))
    seq_p = jnp.pad(seq_sent, ((0, Bp - B), (0, Sp - S)), constant_values=-1)

    has_mask = (mask is not None) or (Sp > S)
    if has_mask:
        base = (jnp.zeros((B, S), jnp.int32) if mask is None
                else mask.astype(jnp.int32))
        mask_p = jnp.pad(base, ((0, Bp - B), (0, Sp - S)), constant_values=1)

    # ---- weights (pre-transposed so the kernel computes x @ W) ----------------
    ue_w = jnp.pad(params["ue_w"].T.astype(jnp.bfloat16),
                   ((0, Hp - H), (0, Hp - H)))                      # (Hp, Hp) bf16
    we_w = jnp.pad(params["we_w"].T.astype(jnp.float32),
                   ((0, Hp - H), (0, Hp - H)))                      # (Hp, Hp) f32
    web = jnp.pad((params["we_b"] + params["ue_b"]).reshape(1, H).astype(jnp.float32),
                  ((0, 0), (0, Hp - H)))                            # ue_b folded in
    ve_w = jnp.pad(params["ve_w"].reshape(1, H).astype(jnp.float32),
                   ((0, 0), (0, Hp - H)))
    expl_w_t = params["expl_w"].T.astype(jnp.bfloat16)              # (2H, N) bf16
    expl_ctx = jnp.pad(expl_w_t[:H], ((0, Hp - H), (0, Np - N)))    # (Hp, Np)
    expl_last = jnp.pad(expl_w_t[H:], ((0, Hp - H), (0, Np - N)))   # (Hp, Np)
    # params["ve_b"] intentionally unused: softmax shift-invariance (see kernel).

    # ---- grid, args & specs ----------------------------------------------------
    grid = (Bp // TB,)
    args = [all_mem_p, last_mem_p, seq_p]
    if has_mask:
        args.append(mask_p)
    args += [ue_w, we_w, web, ve_w, expl_ctx, expl_last]

    def _build_specs(single_buffer_weights):
        def wspec(shape):
            # Weights never change across the batch grid -> single-buffer them.
            if single_buffer_weights:
                return pl.BlockSpec(shape, lambda i: (0, 0),
                                    pipeline_mode=pl.Buffered(1))
            return pl.BlockSpec(shape, lambda i: (0, 0))

        in_specs = [
            pl.BlockSpec((TB, Sp, Hp), lambda i: (i, 0, 0)),        # all_memory
            pl.BlockSpec((TB, Hp), lambda i: (i, 0)),               # last_memory
            pl.BlockSpec((TB, Sp), lambda i: (i, 0)),               # seq_item
        ]
        if has_mask:
            in_specs.append(pl.BlockSpec((TB, Sp), lambda i: (i, 0)))  # mask
        in_specs += [
            wspec((Hp, Hp)),                                        # ue_w
            wspec((Hp, Hp)),                                        # we_w
            wspec((1, Hp)),                                         # we_b + ue_b
            wspec((1, Hp)),                                         # ve_w
            wspec((Hp, Np)),                                        # expl_w (ctx)
            wspec((Hp, Np)),                                        # expl_w (last)
        ]
        out_spec = pl.BlockSpec((TB, Np), lambda i: (i, 0))
        return in_specs, out_spec

    # ---- explicit, generation-aware VMEM budget --------------------------------
    mask_bytes = Sp * 4 if has_mask else 0
    stream_bytes = TB * (Sp * Hp * 2 + Hp * 4 + Sp * 4 + mask_bytes + Np * 4)
    weight_bytes = Hp * Hp * (2 + 4) + 2 * 8 * Hp * 4 + 2 * Hp * Np * 2
    interm_bytes = 3 * TB * Sp * Hp * 4 + 4 * TB * Np * 4
    need = 2 * stream_bytes + 2 * weight_bytes + interm_bytes + (2 << 20)
    vmem_limit = int(min(max(need * 5 // 4, 16 << 20), _vmem_cap_bytes()))

    kernel = functools.partial(_explore_decoder_kernel,
                               num_item=N, has_mask=has_mask)
    out_shape = jax.ShapeDtypeStruct((Bp, Np), jnp.float32)
    cparams = pltpu.CompilerParams(
        dimension_semantics=("parallel",),
        vmem_limit_bytes=vmem_limit)

    def _run(single_buffer_weights):
        in_specs, out_spec = _build_specs(single_buffer_weights)
        return pl.pallas_call(
            kernel,
            grid=grid,
            in_specs=in_specs,
            out_specs=out_spec,
            out_shape=out_shape,
            compiler_params=cparams,
        )(*args)

    try:
        out = _run(True)          # single-buffered constant weights
    except Exception:             # fallback if pipeline_mode / Buffered(1) unsupported
        out = _run(False)
    return out[:B, :N]


def reference(all_memory, last_memory, seq_item, params, mask=None):
    """Pure-JAX (f32) reference mirroring the PyTorch forward (dropout = identity)."""
    N = params["expl_w"].shape[0]
    all_p = all_memory @ params["ue_w"].T + params["ue_b"]
    last_p = last_memory @ params["we_w"].T + params["we_b"]
    hidden = jnp.tanh(all_p + last_p[:, None, :])
    scores = (hidden @ params["ve_w"].T)[..., 0] + params["ve_b"][0]
    if mask is not None:
        scores = jnp.where(mask, -1.0e9, scores)
    attn = jax.nn.softmax(scores, axis=1)
    ctx = jnp.sum(attn[:, :, None] * all_memory, axis=1)
    concat = jnp.concatenate([ctx, last_memory], axis=1)
    logits = concat @ params["expl_w"].T
    onehot = jax.nn.one_hot(seq_item, N, dtype=jnp.float32)
    explore_mask = jnp.einsum("bs,bsn->bn", (seq_item > 0).astype(jnp.float32), onehot)
    logits = jnp.where(explore_mask > 0, -jnp.inf, logits)
    return jax.nn.softmax(logits, axis=1)


if __name__ == "__main__":
    B, S, H, N = 2, 8, 32, 64   # batch, seq_len, hidden_size, num_item

    key = jax.random.PRNGKey(0)
    ks = jax.random.split(key, 10)

    params = {
        "ue_w": 0.1 * jax.random.normal(ks[0], (H, H), jnp.float32),
        "ue_b": 0.1 * jax.random.normal(ks[1], (H,), jnp.float32),
        "we_w": 0.1 * jax.random.normal(ks[2], (H, H), jnp.float32),
        "we_b": 0.1 * jax.random.normal(ks[3], (H,), jnp.float32),
        "ve_w": 0.1 * jax.random.normal(ks[4], (1, H), jnp.float32),
        "ve_b": 0.1 * jax.random.normal(ks[5], (1,), jnp.float32),
        "expl_w": 0.1 * jax.random.normal(ks[6], (N, 2 * H), jnp.float32),
    }

    all_memory = jax.random.normal(ks[7], (B, S, H), jnp.float32)
    last_memory = jax.random.normal(ks[8], (B, H), jnp.float32)
    seq_item = jax.random.randint(ks[9], (B, S), 0, N, jnp.int32)  # 0 == padding id

    # ---- unmasked path (matches PyTorch mask=None) -----------------------------
    out = explore_recommendation_decoder(all_memory, last_memory, seq_item, params, mask=None)
    out = jax.block_until_ready(out)
    ref = reference(all_memory, last_memory, seq_item, params, mask=None)
    assert out.shape == (B, N)
    # bf16 MXU inputs (Ue + explore matmuls) + approx reciprocal in the attention
    # softmax => loose-but-meaningful tolerance vs. the pure-f32 reference.
    assert jnp.allclose(out, ref, rtol=5e-2, atol=5e-3), "mismatch vs JAX reference (unmasked)"
    assert jnp.allclose(out.sum(axis=1), 1.0, atol=1e-4), "output rows must sum to 1"

    # ---- masked path (deterministic mask, never fully masked) ------------------
    mask = jnp.broadcast_to(jnp.arange(S)[None, :] >= S - 2, (B, S))
    out_m = explore_recommendation_decoder(all_memory, last_memory, seq_item, params, mask=mask)
    out_m = jax.block_until_ready(out_m)
    ref_m = reference(all_memory, last_memory, seq_item, params, mask=mask)
    assert jnp.allclose(out_m, ref_m, rtol=5e-2, atol=5e-3), "mismatch vs JAX reference (masked)"
    assert jnp.allclose(out_m.sum(axis=1), 1.0, atol=1e-4), "masked output rows must sum to 1"

    print("KERNEL_OK")
</pallas_src>

<mosaic_0001>
module attributes {stable_mosaic.version = 11 : i64} {
  func.func @_explore_decoder_kernel(%arg0: i32, %arg1: memref<8x8x128xbf16, #tpu.memory_space<vmem>>, %arg2: memref<8x128xf32, #tpu.memory_space<vmem>>, %arg3: memref<8x8xi32, #tpu.memory_space<vmem>>, %arg4: memref<128x128xbf16, #tpu.memory_space<vmem>>, %arg5: memref<128x128xf32, #tpu.memory_space<vmem>>, %arg6: memref<1x128xf32, #tpu.memory_space<vmem>>, %arg7: memref<1x128xf32, #tpu.memory_space<vmem>>, %arg8: memref<128x128xbf16, #tpu.memory_space<vmem>>, %arg9: memref<128x128xbf16, #tpu.memory_space<vmem>>, %arg10: memref<8x128xf32, #tpu.memory_space<vmem>>) attributes {dimension_semantics = [#tpu.dimension_semantics<parallel>], iteration_bounds = array<i64: 1>, scalar_prefetch = 0 : i64, scratch_operands = 0 : i64, tpu.core_type = #tpu.core_type<tc>, window_params = [{transform_indices = @transform_0, window_bounds = array<i64: 8, 8, 128>}, {transform_indices = @transform_1, window_bounds = array<i64: 8, 128>}, {transform_indices = @transform_2, window_bounds = array<i64: 8, 8>}, {pipeline_mode = #tpu.pipeline_mode<synchronous>, transform_indices = @transform_3, window_bounds = array<i64: 128, 128>}, {pipeline_mode = #tpu.pipeline_mode<synchronous>, transform_indices = @transform_4, window_bounds = array<i64: 128, 128>}, {pipeline_mode = #tpu.pipeline_mode<synchronous>, transform_indices = @transform_5, window_bounds = array<i64: 1, 128>}, {pipeline_mode = #tpu.pipeline_mode<synchronous>, transform_indices = @transform_6, window_bounds = array<i64: 1, 128>}, {pipeline_mode = #tpu.pipeline_mode<synchronous>, transform_indices = @transform_7, window_bounds = array<i64: 128, 128>}, {pipeline_mode = #tpu.pipeline_mode<synchronous>, transform_indices = @transform_8, window_bounds = array<i64: 128, 128>}, {transform_indices = @transform_9, window_bounds = array<i64: 8, 128>}]} {
    %c0 = arith.constant 0 : index
    %c0_0 = arith.constant 0 : index
    %c0_1 = arith.constant 0 : index
    %0 = vector.load %arg1[%c0, %c0_0, %c0_1] : memref<8x8x128xbf16, #tpu.memory_space<vmem>>, vector<8x8x128xbf16>
    %c0_2 = arith.constant 0 : index
    %c0_3 = arith.constant 0 : index
    %1 = vector.load %arg2[%c0_2, %c0_3] : memref<8x128xf32, #tpu.memory_space<vmem>>, vector<8x128xf32>
    %2 = vector.shape_cast %0 : vector<8x8x128xbf16> to vector<64x128xbf16>
    %c0_4 = arith.constant 0 : index
    %c0_5 = arith.constant 0 : index
    %3 = vector.load %arg4[%c0_4, %c0_5] : memref<128x128xbf16, #tpu.memory_space<vmem>>, vector<128x128xbf16>
    %cst = arith.constant dense<0.000000e+00> : vector<64x128xf32>
    %4 = tpu.matmul %2, %3, %cst {dimension_numbers = #tpu.dot_dimension_numbers<[1], [0], [0], [1], [0, 0, 1, 1], [], []>} : vector<64x128xbf16>, vector<128x128xbf16>, vector<64x128xf32> -> vector<64x128xf32>
    %5 = vector.shape_cast %4 : vector<64x128xf32> to vector<8x8x128xf32>
    %c0_6 = arith.constant 0 : index
    %c0_7 = arith.constant 0 : index
    %6 = vector.load %arg5[%c0_6, %c0_7] : memref<128x128xf32, #tpu.memory_space<vmem>>, vector<128x128xf32>
    %cst_8 = arith.constant dense<0.000000e+00> : vector<8x128xf32>
    %7 = tpu.matmul %1, %6, %cst_8 {dimension_numbers = #tpu.dot_dimension_numbers<[1], [0], [0], [1], [0, 0, 1, 1], [], []>} : vector<8x128xf32>, vector<128x128xf32>, vector<8x128xf32> -> vector<8x128xf32>
    %c0_9 = arith.constant 0 : index
    %c0_10 = arith.constant 0 : index
    %8 = vector.load %arg6[%c0_9, %c0_10] : memref<1x128xf32, #tpu.memory_space<vmem>>, vector<1x128xf32>
    %9 = vector.broadcast %8 : vector<1x128xf32> to vector<8x128xf32>
    %10 = arith.addf %7, %9 : vector<8x128xf32>
    %11 = vector.shape_cast %10 : vector<8x128xf32> to vector<8x1x128xf32>
    %12 = vector.broadcast %11 : vector<8x1x128xf32> to vector<8x8x128xf32>
    %13 = arith.addf %5, %12 : vector<8x8x128xf32>
    %14 = math.tanh %13 : vector<8x8x128xf32>
    %c0_11 = arith.constant 0 : index
    %c0_12 = arith.constant 0 : index
    %15 = vector.load %arg7[%c0_11, %c0_12] : memref<1x128xf32, #tpu.memory_space<vmem>>, vector<1x128xf32>
    %16 = vector.shape_cast %15 : vector<1x128xf32> to vector<1x1x128xf32>
    %17 = vector.broadcast %16 : vector<1x1x128xf32> to vector<8x8x128xf32>
    %18 = arith.mulf %14, %17 : vector<8x8x128xf32>
    %cst_13 = arith.constant dense<0.000000e+00> : vector<8x8xf32>
    %19 = vector.multi_reduction <add>, %18, %cst_13 [2] : vector<8x8x128xf32> to vector<8x8xf32>
    %cst_14 = arith.constant dense<0xFF800000> : vector<8xf32>
    %20 = vector.multi_reduction <maximumf>, %19, %cst_14 [1] : vector<8x8xf32> to vector<8xf32>
    %21 = vector.shape_cast %20 : vector<8xf32> to vector<8x1xf32>
    %22 = vector.broadcast %21 : vector<8x1xf32> to vector<8x8xf32>
    %23 = arith.subf %19, %22 : vector<8x8xf32>
    %24 = math.exp %23 : vector<8x8xf32>
    %cst_15 = arith.constant dense<0.000000e+00> : vector<8xf32>
    %25 = vector.multi_reduction <add>, %24, %cst_15 [1] : vector<8x8xf32> to vector<8xf32>
    %26 = vector.shape_cast %25 : vector<8xf32> to vector<8x1xf32>
    %27 = tpu.reciprocal %26 {approx = true} : vector<8x1xf32> -> vector<8x1xf32>
    %28 = vector.broadcast %27 : vector<8x1xf32> to vector<8x8xf32>
    %29 = arith.mulf %24, %28 : vector<8x8xf32>
    %30 = vector.shape_cast %29 : vector<8x8xf32> to vector<8x8x1xf32>
    %31 = arith.extf %0 : vector<8x8x128xbf16> to vector<8x8x128xf32>
    %32 = vector.broadcast %30 : vector<8x8x1xf32> to vector<8x8x128xf32>
    %33 = arith.mulf %32, %31 : vector<8x8x128xf32>
    %cst_16 = arith.constant dense<0.000000e+00> : vector<8x128xf32>
    %34 = vector.multi_reduction <add>, %33, %cst_16 [1] : vector<8x8x128xf32> to vector<8x128xf32>
    %35 = arith.truncf %34 : vector<8x128xf32> to vector<8x128xbf16>
    %c0_17 = arith.constant 0 : index
    %c0_18 = arith.constant 0 : index
    %36 = vector.load %arg8[%c0_17, %c0_18] : memref<128x128xbf16, #tpu.memory_space<vmem>>, vector<128x128xbf16>
    %cst_19 = arith.constant dense<0.000000e+00> : vector<8x128xf32>
    %37 = tpu.matmul %35, %36, %cst_19 {dimension_numbers = #tpu.dot_dimension_numbers<[1], [0], [0], [1], [0, 0, 1, 1], [], []>} : vector<8x128xbf16>, vector<128x128xbf16>, vector<8x128xf32> -> vector<8x128xf32>
    %38 = arith.truncf %1 : vector<8x128xf32> to vector<8x128xbf16>
    %c0_20 = arith.constant 0 : index
    %c0_21 = arith.constant 0 : index
    %39 = vector.load %arg9[%c0_20, %c0_21] : memref<128x128xbf16, #tpu.memory_space<vmem>>, vector<128x128xbf16>
    %cst_22 = arith.constant dense<0.000000e+00> : vector<8x128xf32>
    %40 = tpu.matmul %38, %39, %cst_22 {dimension_numbers = #tpu.dot_dimension_numbers<[1], [0], [0], [1], [0, 0, 1, 1], [], []>} : vector<8x128xbf16>, vector<128x128xbf16>, vector<8x128xf32> -> vector<8x128xf32>
    %41 = arith.addf %37, %40 : vector<8x128xf32>
    %c0_23 = arith.constant 0 : index
    %c0_24 = arith.constant 0 : index
    %42 = vector.load %arg3[%c0_23, %c0_24] : memref<8x8xi32, #tpu.memory_space<vmem>>, vector<8x8xi32>
    %43 = tpu.iota {dimensions = array<i32: 1>} : vector<8x128xi32>
    %c64_i32 = arith.constant 64 : i32
    %44 = vector.broadcast %c64_i32 : i32 to vector<8x128xi32>
    %45 = arith.cmpi sge, %43, %44 : vector<8x128xi32>
    %46 = vector.extract_strided_slice %42 {offsets = [0, 0], sizes = [8, 1], strides = [1, 1]} : vector<8x8xi32> to vector<8x1xi32>
    %47 = vector.broadcast %46 : vector<8x1xi32> to vector<8x128xi32>
    %48 = arith.cmpi eq, %43, %47 : vector<8x128xi32>
    %49 = arith.ori %45, %48 : vector<8x128xi1>
    %50 = vector.extract_strided_slice %42 {offsets = [0, 1], sizes = [8, 1], strides = [1, 1]} : vector<8x8xi32> to vector<8x1xi32>
    %51 = vector.broadcast %50 : vector<8x1xi32> to vector<8x128xi32>
    %52 = arith.cmpi eq, %43, %51 : vector<8x128xi32>
    %53 = arith.ori %49, %52 : vector<8x128xi1>
    %54 = vector.extract_strided_slice %42 {offsets = [0, 2], sizes = [8, 1], strides = [1, 1]} : vector<8x8xi32> to vector<8x1xi32>
    %55 = vector.broadcast %54 : vector<8x1xi32> to vector<8x128xi32>
    %56 = arith.cmpi eq, %43, %55 : vector<8x128xi32>
    %57 = arith.ori %53, %56 : vector<8x128xi1>
    %58 = vector.extract_strided_slice %42 {offsets = [0, 3], sizes = [8, 1], strides = [1, 1]} : vector<8x8xi32> to vector<8x1xi32>
    %59 = vector.broadcast %58 : vector<8x1xi32> to vector<8x128xi32>
    %60 = arith.cmpi eq, %43, %59 : vector<8x128xi32>
    %61 = arith.ori %57, %60 : vector<8x128xi1>
    %62 = vector.extract_strided_slice %42 {offsets = [0, 4], sizes = [8, 1], strides = [1, 1]} : vector<8x8xi32> to vector<8x1xi32>
    %63 = vector.broadcast %62 : vector<8x1xi32> to vector<8x128xi32>
    %64 = arith.cmpi eq, %43, %63 : vector<8x128xi32>
    %65 = arith.ori %61, %64 : vector<8x128xi1>
    %66 = vector.extract_strided_slice %42 {offsets = [0, 5], sizes = [8, 1], strides = [1, 1]} : vector<8x8xi32> to vector<8x1xi32>
    %67 = vector.broadcast %66 : vector<8x1xi32> to vector<8x128xi32>
    %68 = arith.cmpi eq, %43, %67 : vector<8x128xi32>
    %69 = arith.ori %65, %68 : vector<8x128xi1>
    %70 = vector.extract_strided_slice %42 {offsets = [0, 6], sizes = [8, 1], strides = [1, 1]} : vector<8x8xi32> to vector<8x1xi32>
    %71 = vector.broadcast %70 : vector<8x1xi32> to vector<8x128xi32>
    %72 = arith.cmpi eq, %43, %71 : vector<8x128xi32>
    %73 = arith.ori %69, %72 : vector<8x128xi1>
    %74 = vector.extract_strided_slice %42 {offsets = [0, 7], sizes = [8, 1], strides = [1, 1]} : vector<8x8xi32> to vector<8x1xi32>
    %75 = vector.broadcast %74 : vector<8x1xi32> to vector<8x128xi32>
    %76 = arith.cmpi eq, %43, %75 : vector<8x128xi32>
    %77 = arith.ori %73, %76 : vector<8x128xi1>
    %cst_25 = arith.constant 0xFF800000 : f32
    %78 = vector.broadcast %cst_25 : f32 to vector<8x128xf32>
    %79 = arith.select %77, %78, %41 : vector<8x128xi1>, vector<8x128xf32>
    %cst_26 = arith.constant dense<0xFF800000> : vector<8xf32>
    %80 = vector.multi_reduction <maximumf>, %79, %cst_26 [1] : vector<8x128xf32> to vector<8xf32>
    %81 = vector.shape_cast %80 : vector<8xf32> to vector<8x1xf32>
    %82 = vector.broadcast %81 : vector<8x1xf32> to vector<8x128xf32>
    %83 = arith.subf %79, %82 : vector<8x128xf32>
    %84 = math.exp %83 : vector<8x128xf32>
    %cst_27 = arith.constant dense<0.000000e+00> : vector<8xf32>
    %85 = vector.multi_reduction <add>, %84, %cst_27 [1] : vector<8x128xf32> to vector<8xf32>
    %86 = vector.shape_cast %85 : vector<8xf32> to vector<8x1xf32>
    %87 = tpu.reciprocal %86 : vector<8x1xf32> -> vector<8x1xf32>
    %88 = vector.broadcast %87 : vector<8x1xf32> to vector<8x128xf32>
    %89 = arith.mulf %84, %88 : vector<8x128xf32>
    %c0_28 = arith.constant 0 : index
    %c0_29 = arith.constant 0 : index
    %90 = vector.load %arg10[%c0_28, %c0_29] : memref<8x128xf32, #tpu.memory_space<vmem>>, vector<8x128xf32>
    tpu.vector_store %arg10[%c0_28, %c0_29], %89 {strides = array<i32>} : memref<8x128xf32, #tpu.memory_space<vmem>>, vector<8x128xf32>,
    return
  }
  func.func @transform_0(%arg0: i32) -> (i32, i32, i32) {
    %c0_i32 = arith.constant 0 : i32
    %c0_i32_0 = arith.constant 0 : i32
    %c0_i32_1 = arith.constant 0 : i32
    return %arg0, %c0_i32, %c0_i32_0 : i32, i32, i32
  }
  func.func @transform_1(%arg0: i32) -> (i32, i32) {
    %c0_i32 = arith.constant 0 : i32
    %c0_i32_0 = arith.constant 0 : i32
    return %arg0, %c0_i32 : i32, i32
  }
  func.func @transform_2(%arg0: i32) -> (i32, i32) {
    %c0_i32 = arith.constant 0 : i32
    %c0_i32_0 = arith.constant 0 : i32
    return %arg0, %c0_i32 : i32, i32
  }
  func.func @transform_3(%arg0: i32) -> (i32, i32) {
    %c0_i32 = arith.constant 0 : i32
    %c0_i32_0 = arith.constant 0 : i32
    %c0_i32_1 = arith.constant 0 : i32
    return %c0_i32, %c0_i32_0 : i32, i32
  }
  func.func @transform_4(%arg0: i32) -> (i32, i32) {
    %c0_i32 = arith.constant 0 : i32
    %c0_i32_0 = arith.constant 0 : i32
    %c0_i32_1 = arith.constant 0 : i32
    return %c0_i32, %c0_i32_0 : i32, i32
  }
  func.func @transform_5(%arg0: i32) -> (i32, i32) {
    %c0_i32 = arith.constant 0 : i32
    %c0_i32_0 = arith.constant 0 : i32
    %c0_i32_1 = arith.constant 0 : i32
    return %c0_i32, %c0_i32_0 : i32, i32
  }
  func.func @transform_6(%arg0: i32) -> (i32, i32) {
    %c0_i32 = arith.constant 0 : i32
    %c0_i32_0 = arith.constant 0 : i32
    %c0_i32_1 = arith.constant 0 : i32
    return %c0_i32, %c0_i32_0 : i32, i32
  }
  func.func @transform_7(%arg0: i32) -> (i32, i32) {
    %c0_i32 = arith.constant 0 : i32
    %c0_i32_0 = arith.constant 0 : i32
    %c0_i32_1 = arith.constant 0 : i32
    return %c0_i32, %c0_i32_0 : i32, i32
  }
  func.func @transform_8(%arg0: i32) -> (i32, i32) {
    %c0_i32 = arith.constant 0 : i32
    %c0_i32_0 = arith.constant 0 : i32
    %c0_i32_1 = arith.constant 0 : i32
    return %c0_i32, %c0_i32_0 : i32, i32
  }
  func.func @transform_9(%arg0: i32) -> (i32, i32) {
    %c0_i32 = arith.constant 0 : i32
    %c0_i32_0 = arith.constant 0 : i32
    return %arg0, %c0_i32 : i32, i32
  }
}

module attributes {stable_mosaic.version = 11 : i64} {
  func.func @_explore_decoder_kernel(%arg0: i32, %arg1: memref<8x8x128xbf16, #tpu.memory_space<vmem>>, %arg2: memref<8x128xf32, #tpu.memory_space<vmem>>, %arg3: memref<8x8xi32, #tpu.memory_space<vmem>>, %arg4: memref<128x128xbf16, #tpu.memory_space<vmem>>, %arg5: memref<128x128xf32, #tpu.memory_space<vmem>>, %arg6: memref<1x128xf32, #tpu.memory_space<vmem>>, %arg7: memref<1x128xf32, #tpu.memory_space<vmem>>, %arg8: memref<128x128xbf16, #tpu.memory_space<vmem>>, %arg9: memref<128x128xbf16, #tpu.memory_space<vmem>>, %arg10: memref<8x128xf32, #tpu.memory_space<vmem>>) attributes {dimension_semantics = [#tpu.dimension_semantics<parallel>], iteration_bounds = array<i64: 1>, scalar_prefetch = 0 : i64, scratch_operands = 0 : i64, tpu.core_type = #tpu.core_type<tc>, window_params = [{transform_indices = @transform_0, window_bounds = array<i64: 8, 8, 128>}, {transform_indices = @transform_1, window_bounds = array<i64: 8, 128>}, {transform_indices = @transform_2, window_bounds = array<i64: 8, 8>}, {pipeline_mode = #tpu.pipeline_mode<synchronous>, transform_indices = @transform_3, window_bounds = array<i64: 128, 128>}, {pipeline_mode = #tpu.pipeline_mode<synchronous>, transform_indices = @transform_4, window_bounds = array<i64: 128, 128>}, {pipeline_mode = #tpu.pipeline_mode<synchronous>, transform_indices = @transform_5, window_bounds = array<i64: 1, 128>}, {pipeline_mode = #tpu.pipeline_mode<synchronous>, transform_indices = @transform_6, window_bounds = array<i64: 1, 128>}, {pipeline_mode = #tpu.pipeline_mode<synchronous>, transform_indices = @transform_7, window_bounds = array<i64: 128, 128>}, {pipeline_mode = #tpu.pipeline_mode<synchronous>, transform_indices = @transform_8, window_bounds = array<i64: 128, 128>}, {transform_indices = @transform_9, window_bounds = array<i64: 8, 128>}]} {
    %c0 = arith.constant 0 : index
    %c0_0 = arith.constant 0 : index
    %c0_1 = arith.constant 0 : index
    %0 = vector.load %arg1[%c0, %c0_0, %c0_1] : memref<8x8x128xbf16, #tpu.memory_space<vmem>>, vector<8x8x128xbf16>
    %c0_2 = arith.constant 0 : index
    %c0_3 = arith.constant 0 : index
    %1 = vector.load %arg2[%c0_2, %c0_3] : memref<8x128xf32, #tpu.memory_space<vmem>>, vector<8x128xf32>
    %2 = vector.shape_cast %0 : vector<8x8x128xbf16> to vector<64x128xbf16>
    %c0_4 = arith.constant 0 : index
    %c0_5 = arith.constant 0 : index
    %3 = vector.load %arg4[%c0_4, %c0_5] : memref<128x128xbf16, #tpu.memory_space<vmem>>, vector<128x128xbf16>
    %cst = arith.constant dense<0.000000e+00> : vector<64x128xf32>
    %4 = tpu.matmul %2, %3, %cst {dimension_numbers = #tpu.dot_dimension_numbers<[1], [0], [0], [1], [0, 0, 1, 1], [], []>} : vector<64x128xbf16>, vector<128x128xbf16>, vector<64x128xf32> -> vector<64x128xf32>
    %5 = vector.shape_cast %4 : vector<64x128xf32> to vector<8x8x128xf32>
    %c0_6 = arith.constant 0 : index
    %c0_7 = arith.constant 0 : index
    %6 = vector.load %arg5[%c0_6, %c0_7] : memref<128x128xf32, #tpu.memory_space<vmem>>, vector<128x128xf32>
    %cst_8 = arith.constant dense<0.000000e+00> : vector<8x128xf32>
    %7 = tpu.matmul %1, %6, %cst_8 {dimension_numbers = #tpu.dot_dimension_numbers<[1], [0], [0], [1], [0, 0, 1, 1], [], []>} : vector<8x128xf32>, vector<128x128xf32>, vector<8x128xf32> -> vector<8x128xf32>
    %c0_9 = arith.constant 0 : index
    %c0_10 = arith.constant 0 : index
    %8 = vector.load %arg6[%c0_9, %c0_10] : memref<1x128xf32, #tpu.memory_space<vmem>>, vector<1x128xf32>
    %9 = vector.broadcast %8 : vector<1x128xf32> to vector<8x128xf32>
    %10 = arith.addf %7, %9 : vector<8x128xf32>
    %11 = vector.shape_cast %10 : vector<8x128xf32> to vector<8x1x128xf32>
    %12 = vector.broadcast %11 : vector<8x1x128xf32> to vector<8x8x128xf32>
    %13 = arith.addf %5, %12 : vector<8x8x128xf32>
    %14 = math.tanh %13 : vector<8x8x128xf32>
    %c0_11 = arith.constant 0 : index
    %c0_12 = arith.constant 0 : index
    %15 = vector.load %arg7[%c0_11, %c0_12] : memref<1x128xf32, #tpu.memory_space<vmem>>, vector<1x128xf32>
    %16 = vector.shape_cast %15 : vector<1x128xf32> to vector<1x1x128xf32>
    %17 = vector.broadcast %16 : vector<1x1x128xf32> to vector<8x8x128xf32>
    %18 = arith.mulf %14, %17 : vector<8x8x128xf32>
    %cst_13 = arith.constant dense<0.000000e+00> : vector<8x8xf32>
    %19 = vector.multi_reduction <add>, %18, %cst_13 [2] : vector<8x8x128xf32> to vector<8x8xf32>
    %cst_14 = arith.constant dense<0xFF800000> : vector<8xf32>
    %20 = vector.multi_reduction <maximumf>, %19, %cst_14 [1] : vector<8x8xf32> to vector<8xf32>
    %21 = vector.shape_cast %20 : vector<8xf32> to vector<8x1xf32>
    %22 = vector.broadcast %21 : vector<8x1xf32> to vector<8x8xf32>
    %23 = arith.subf %19, %22 : vector<8x8xf32>
    %24 = math.exp %23 : vector<8x8xf32>
    %cst_15 = arith.constant dense<0.000000e+00> : vector<8xf32>
    %25 = vector.multi_reduction <add>, %24, %cst_15 [1] : vector<8x8xf32> to vector<8xf32>
    %26 = vector.shape_cast %25 : vector<8xf32> to vector<8x1xf32>
    %27 = tpu.reciprocal %26 {approx = true} : vector<8x1xf32> -> vector<8x1xf32>
    %28 = vector.broadcast %27 : vector<8x1xf32> to vector<8x8xf32>
    %29 = arith.mulf %24, %28 : vector<8x8xf32>
    %30 = vector.shape_cast %29 : vector<8x8xf32> to vector<8x8x1xf32>
    %31 = arith.extf %0 : vector<8x8x128xbf16> to vector<8x8x128xf32>
    %32 = vector.broadcast %30 : vector<8x8x1xf32> to vector<8x8x128xf32>
    %33 = arith.mulf %32, %31 : vector<8x8x128xf32>
    %cst_16 = arith.constant dense<0.000000e+00> : vector<8x128xf32>
    %34 = vector.multi_reduction <add>, %33, %cst_16 [1] : vector<8x8x128xf32> to vector<8x128xf32>
    %35 = arith.truncf %34 : vector<8x128xf32> to vector<8x128xbf16>
    %c0_17 = arith.constant 0 : index
    %c0_18 = arith.constant 0 : index
    %36 = vector.load %arg8[%c0_17, %c0_18] : memref<128x128xbf16, #tpu.memory_space<vmem>>, vector<128x128xbf16>
    %cst_19 = arith.constant dense<0.000000e+00> : vector<8x128xf32>
    %37 = tpu.matmul %35, %36, %cst_19 {dimension_numbers = #tpu.dot_dimension_numbers<[1], [0], [0], [1], [0, 0, 1, 1], [], []>} : vector<8x128xbf16>, vector<128x128xbf16>, vector<8x128xf32> -> vector<8x128xf32>
    %38 = arith.truncf %1 : vector<8x128xf32> to vector<8x128xbf16>
    %c0_20 = arith.constant 0 : index
    %c0_21 = arith.constant 0 : index
    %39 = vector.load %arg9[%c0_20, %c0_21] : memref<128x128xbf16, #tpu.memory_space<vmem>>, vector<128x128xbf16>
    %cst_22 = arith.constant dense<0.000000e+00> : vector<8x128xf32>
    %40 = tpu.matmul %38, %39, %cst_22 {dimension_numbers = #tpu.dot_dimension_numbers<[1], [0], [0], [1], [0, 0, 1, 1], [], []>} : vector<8x128xbf16>, vector<128x128xbf16>, vector<8x128xf32> -> vector<8x128xf32>
    %41 = arith.addf %37, %40 : vector<8x128xf32>
    %c0_23 = arith.constant 0 : index
    %c0_24 = arith.constant 0 : index
    %42 = vector.load %arg3[%c0_23, %c0_24] : memref<8x8xi32, #tpu.memory_space<vmem>>, vector<8x8xi32>
    %43 = tpu.iota {dimensions = array<i32: 1>} : vector<8x128xi32>
    %c64_i32 = arith.constant 64 : i32
    %44 = vector.broadcast %c64_i32 : i32 to vector<8x128xi32>
    %45 = arith.cmpi sge, %43, %44 : vector<8x128xi32>
    %46 = vector.extract_strided_slice %42 {offsets = [0, 0], sizes = [8, 1], strides = [1, 1]} : vector<8x8xi32> to vector<8x1xi32>
    %47 = vector.broadcast %46 : vector<8x1xi32> to vector<8x128xi32>
    %48 = arith.cmpi eq, %43, %47 : vector<8x128xi32>
    %49 = arith.ori %45, %48 : vector<8x128xi1>
    %50 = vector.extract_strided_slice %42 {offsets = [0, 1], sizes = [8, 1], strides = [1, 1]} : vector<8x8xi32> to vector<8x1xi32>
    %51 = vector.broadcast %50 : vector<8x1xi32> to vector<8x128xi32>
    %52 = arith.cmpi eq, %43, %51 : vector<8x128xi32>
    %53 = arith.ori %49, %52 : vector<8x128xi1>
    %54 = vector.extract_strided_slice %42 {offsets = [0, 2], sizes = [8, 1], strides = [1, 1]} : vector<8x8xi32> to vector<8x1xi32>
    %55 = vector.broadcast %54 : vector<8x1xi32> to vector<8x128xi32>
    %56 = arith.cmpi eq, %43, %55 : vector<8x128xi32>
    %57 = arith.ori %53, %56 : vector<8x128xi1>
    %58 = vector.extract_strided_slice %42 {offsets = [0, 3], sizes = [8, 1], strides = [1, 1]} : vector<8x8xi32> to vector<8x1xi32>
    %59 = vector.broadcast %58 : vector<8x1xi32> to vector<8x128xi32>
    %60 = arith.cmpi eq, %43, %59 : vector<8x128xi32>
    %61 = arith.ori %57, %60 : vector<8x128xi1>
    %62 = vector.extract_strided_slice %42 {offsets = [0, 4], sizes = [8, 1], strides = [1, 1]} : vector<8x8xi32> to vector<8x1xi32>
    %63 = vector.broadcast %62 : vector<8x1xi32> to vector<8x128xi32>
    %64 = arith.cmpi eq, %43, %63 : vector<8x128xi32>
    %65 = arith.ori %61, %64 : vector<8x128xi1>
    %66 = vector.extract_strided_slice %42 {offsets = [0, 5], sizes = [8, 1], strides = [1, 1]} : vector<8x8xi32> to vector<8x1xi32>
    %67 = vector.broadcast %66 : vector<8x1xi32> to vector<8x128xi32>
    %68 = arith.cmpi eq, %43, %67 : vector<8x128xi32>
    %69 = arith.ori %65, %68 : vector<8x128xi1>
    %70 = vector.extract_strided_slice %42 {offsets = [0, 6], sizes = [8, 1], strides = [1, 1]} : vector<8x8xi32> to vector<8x1xi32>
    %71 = vector.broadcast %70 : vector<8x1xi32> to vector<8x128xi32>
    %72 = arith.cmpi eq, %43, %71 : vector<8x128xi32>
    %73 = arith.ori %69, %72 : vector<8x128xi1>
    %74 = vector.extract_strided_slice %42 {offsets = [0, 7], sizes = [8, 1], strides = [1, 1]} : vector<8x8xi32> to vector<8x1xi32>
    %75 = vector.broadcast %74 : vector<8x1xi32> to vector<8x128xi32>
    %76 = arith.cmpi eq, %43, %75 : vector<8x128xi32>
    %77 = arith.ori %73, %76 : vector<8x128xi1>
    %cst_25 = arith.constant 0xFF800000 : f32
    %78 = vector.broadcast %cst_25 : f32 to vector<8x128xf32>
    %79 = arith.select %77, %78, %41 : vector<8x128xi1>, vector<8x128xf32>
    %cst_26 = arith.constant dense<0xFF800000> : vector<8xf32>
    %80 = vector.multi_reduction <maximumf>, %79, %cst_26 [1] : vector<8x128xf32> to vector<8xf32>
    %81 = vector.shape_cast %80 : vector<8xf32> to vector<8x1xf32>
    %82 = vector.broadcast %81 : vector<8x1xf32> to vector<8x128xf32>
    %83 = arith.subf %79, %82 : vector<8x128xf32>
    %84 = math.exp %83 : vector<8x128xf32>
    %cst_27 = arith.constant dense<0.000000e+00> : vector<8xf32>
    %85 = vector.multi_reduction <add>, %84, %cst_27 [1] : vector<8x128xf32> to vector<8xf32>
    %86 = vector.shape_cast %85 : vector<8xf32> to vector<8x1xf32>
    %87 = tpu.reciprocal %86 : vector<8x1xf32> -> vector<8x1xf32>
    %88 = vector.broadcast %87 : vector<8x1xf32> to vector<8x128xf32>
    %89 = arith.mulf %84, %88 : vector<8x128xf32>
    %c0_28 = arith.constant 0 : index
    %c0_29 = arith.constant 0 : index
    %90 = vector.load %arg10[%c0_28, %c0_29] : memref<8x128xf32, #tpu.memory_space<vmem>>, vector<8x128xf32>
    tpu.vector_store %arg10[%c0_28, %c0_29], %89 {strides = array<i32>} : memref<8x128xf32, #tpu.memory_space<vmem>>, vector<8x128xf32>,
    return
  }
  func.func @transform_0(%arg0: i32) -> (i32, i32, i32) {
    %c0_i32 = arith.constant 0 : i32
    %c0_i32_0 = arith.constant 0 : i32
    %c0_i32_1 = arith.constant 0 : i32
    return %arg0, %c0_i32, %c0_i32_0 : i32, i32, i32
  }
  func.func @transform_1(%arg0: i32) -> (i32, i32) {
    %c0_i32 = arith.constant 0 : i32
    %c0_i32_0 = arith.constant 0 : i32
    return %arg0, %c0_i32 : i32, i32
  }
  func.func @transform_2(%arg0: i32) -> (i32, i32) {
    %c0_i32 = arith.constant 0 : i32
    %c0_i32_0 = arith.constant 0 : i32
    return %arg0, %c0_i32 : i32, i32
  }
  func.func @transform_3(%arg0: i32) -> (i32, i32) {
    %c0_i32 = arith.constant 0 : i32
    %c0_i32_0 = arith.constant 0 : i32
    %c0_i32_1 = arith.constant 0 : i32
    return %c0_i32, %c0_i32_0 : i32, i32
  }
  func.func @transform_4(%arg0: i32) -> (i32, i32) {
    %c0_i32 = arith.constant 0 : i32
    %c0_i32_0 = arith.constant 0 : i32
    %c0_i32_1 = arith.constant 0 : i32
    return %c0_i32, %c0_i32_0 : i32, i32
  }
  func.func @transform_5(%arg0: i32) -> (i32, i32) {
    %c0_i32 = arith.constant 0 : i32
    %c0_i32_0 = arith.constant 0 : i32
    %c0_i32_1 = arith.constant 0 : i32
    return %c0_i32, %c0_i32_0 : i32, i32
  }
  func.func @transform_6(%arg0: i32) -> (i32, i32) {
    %c0_i32 = arith.constant 0 : i32
    %c0_i32_0 = arith.constant 0 : i32
    %c0_i32_1 = arith.constant 0 : i32
    return %c0_i32, %c0_i32_0 : i32, i32
  }
  func.func @transform_7(%arg0: i32) -> (i32, i32) {
    %c0_i32 = arith.constant 0 : i32
    %c0_i32_0 = arith.constant 0 : i32
    %c0_i32_1 = arith.constant 0 : i32
    return %c0_i32, %c0_i32_0 : i32, i32
  }
  func.func @transform_8(%arg0: i32) -> (i32, i32) {
    %c0_i32 = arith.constant 0 : i32
    %c0_i32_0 = arith.constant 0 : i32
    %c0_i32_1 = arith.constant 0 : i32
    return %c0_i32, %c0_i32_0 : i32, i32
  }
  func.func @transform_9(%arg0: i32) -> (i32, i32) {
    %c0_i32 = arith.constant 0 : i32
    %c0_i32_0 = arith.constant 0 : i32
    return %arg0, %c0_i32 : i32, i32
  }
}

</mosaic_0001>

<bundles_post_ra>
// kernel: tpu_custom_call.1
= control target key start
LH: loop header
LB: loop body
LE: loop exit
PB: predicated region body
PF: predicated region fallthrough
CT: control target
= control target key end

     0   :  { %14 = vsyncpa [#allocation3], 0  ;;  %s1944_s0 = inlined_call_operand.hbm [shape: bf16[8,8,128], index: 0, kind: input, shape index: {}]   ;;  %s1945_s1 = inlined_call_operand.hbm [shape: f32[8,128], index: 1, kind: input, shape index: {}]   ;;  %s1946_s2 = inlined_call_operand.hbm [shape: s32[8,8], index: 2, kind: input, shape index: {}]   ;;  %s1947_s3 = inlined_call_operand.hbm [shape: bf16[128,128], index: 3, kind: input, shape index: {}]   ;;  %s1948_s4 = inlined_call_operand.hbm [shape: f32[128,128], index: 4, kind: input, shape index: {}]   ;;  %s1949_s5 = inlined_call_operand.vmem [shape: f32[1,128], index: 5, kind: input, shape index: {}]   ;;  %s1950_s6 = inlined_call_operand.vmem [shape: f32[1,128], index: 6, kind: input, shape index: {}]   ;;  %s1951_s7 = inlined_call_operand.hbm [shape: bf16[128,128], index: 7, kind: input, shape index: {}]   ;;  %s1952_s8 = inlined_call_operand.hbm [shape: bf16[128,128], index: 8, kind: input, shape index: {}]   ;;  %s1953_s9 = inlined_call_operand.hbm [shape: f32[8,128], index: 9, kind: output, shape index: {}]  }
   0x1   :  { %15 = vsyncpa [#allocation6], 0 }
   0x2   :  { %16 = vsyncpa [#allocation9], 0 }
   0x3   :  { %17 = vsyncpa [#allocation12], 0 }
   0x4   :  { %18 = vsyncpa [#allocation4], 0  ;;  %s1633_s30 = smov [#allocation5]  }
   0x5   :  { %s37_s10 = sshll.u32 %s1633_s30, 4  ;;  %s38_s10 = int_to_ptr.vmem [resolvable:$true] %s37_s10 }
   0x6   :  { %s1471_s11 = scalar_lea.vmem %s38_s10, 128  ;;  %p1476_p1 = scmp.lt.s32.totalorder %s38_s10, %s38_s10 }
   0x7   :  { %p1472_p0 = scmp.ne.s32.totalorder %s38_s10, %s1471_s11  ;;  %p1477_p2 = scmp.lt.s32.totalorder %s1471_s11, %s1471_s11 }
   0x9   :  { %p1478_p3 = por %p1477_p2, %p1476_p1 }
   0xb   :  { %p1479_p4 = pnand %p1478_p3, %p1472_p0 }
   0xd   :  { %1482 = shalt.err (!%p1479_p4)
}
   0xe   :  { %40 = dma.hbm_to_vmem [thread:$0]  %s1945_s1, 128, %s38_s10, [#allocation6]  }
   0xf   :  { %s1634_s14 = smov [#allocation8]   ;;  %s1635_s16 = smov [#allocation11]  }
  0x10   :  { %s56_s15 = sshll.u32 %s1634_s14, 4  ;;  %s84_s17 = sshll.u32 %s1635_s16, 4  ;;  %s57_s15 = int_to_ptr.vmem [resolvable:$true] %s56_s15  ;;  %s85_s17 = int_to_ptr.vmem [resolvable:$true] %s84_s17 }
  0x11   :  { %s1491_s18 = scalar_lea.vmem %s57_s15, 1024  ;;  %p1496_p6 = scmp.lt.s32.totalorder %s57_s15, %s57_s15 }
  0x12   :  { %p1492_p5 = scmp.ne.s32.totalorder %s57_s15, %s1491_s18  ;;  %p1497_p7 = scmp.lt.s32.totalorder %s1491_s18, %s1491_s18 }
  0x14   :  { %p1498_p8 = por %p1497_p7, %p1496_p6 }
  0x16   :  { %p1499_p9 = pnand %p1498_p8, %p1492_p5 }
  0x18   :  { %1502 = shalt.err (!%p1499_p9)
}
  0x19   :  { %s1636_s19 = smov 64   ;;  %s1637_s20 = smov 4  }
  0x1a   :  { %62 = dma.hbm_to_vmem [thread:$0]  %s1947_s3, 1024, %s57_s15, [#allocation9], %s1636_s19, %s1636_s19, %s1637_s20  }
  0x1b   :  { %s1511_s1 = scalar_lea.vmem %s85_s17, 1024  ;;  %p1516_p11 = scmp.lt.s32.totalorder %s85_s17, %s85_s17 }
  0x1c   :  { %p1512_p10 = scmp.ne.s32.totalorder %s85_s17, %s1511_s1  ;;  %p1517_p12 = scmp.lt.s32.totalorder %s1511_s1, %s1511_s1 }
  0x1e   :  { %p1518_p13 = por %p1517_p12, %p1516_p11 }
  0x20   :  { %p1519_p0 = pnand %p1518_p13, %p1512_p10 }
  0x22   :  { %1522 = shalt.err (!%p1519_p0)
}
  0x23   :  { %90 = dma.hbm_to_vmem [thread:$0]  %s1951_s7, 1024, %s85_s17, [#allocation12], %s1636_s19, %s1636_s19, %s1637_s20  }
  0x24   :  { %s1638_s25 = smov [#allocation2]   ;;  %s1639_s27 = smov [#allocation7]  }
  0x25   :  { %s24_s26 = sshll.u32 %s1638_s25, 4  ;;  %s47_s3 = sshll.u32 %s1639_s27, 4  ;;  %s25_s26 = int_to_ptr.vmem [resolvable:$true] %s24_s26  ;;  %s48_s3 = int_to_ptr.vmem [resolvable:$true] %s47_s3 }
  0x26   :  { %s1531_s28 = scalar_lea.vmem %s25_s26, 512  ;;  %p1536_p2 = scmp.lt.s32.totalorder %s25_s26, %s25_s26 }
  0x27   :  { %p1532_p1 = scmp.ne.s32.totalorder %s25_s26, %s1531_s28  ;;  %p1537_p3 = scmp.lt.s32.totalorder %s1531_s28, %s1531_s28 }
  0x29   :  { %p1538_p4 = por %p1537_p3, %p1536_p2 }
  0x2b   :  { %p1539_p5 = pnand %p1538_p4, %p1532_p1 }
  0x2d   :  { %1542 = shalt.err (!%p1539_p5)
}
  0x2e   :  { %30 = dma.hbm_to_vmem [thread:$0]  %s1944_s0, 512, %s25_s26, [#allocation3], %s1636_s19, %s1636_s19, %s1637_s20  }
  0x2f   :  { %s1551_s7 = scalar_lea.vmem %s48_s3, 128  ;;  %p1556_p7 = scmp.lt.s32.totalorder %s48_s3, %s48_s3 }
  0x30   :  { %p1552_p6 = scmp.ne.s32.totalorder %s48_s3, %s1551_s7  ;;  %p1557_p8 = scmp.lt.s32.totalorder %s1551_s7, %s1551_s7 }
  0x32   :  { %p1558_p9 = por %p1557_p8, %p1556_p7 }
  0x34   :  { %p1559_p10 = pnand %p1558_p9, %p1552_p6 }
  0x36   :  { %1562 = shalt.err (!%p1559_p10)
}
  0x37   :  { %50 = dma.hbm_to_vmem [thread:$0]  %s1946_s2, 128, %s48_s3, [#allocation6]  }
  0x38   :  { %s1640_s12 = smov [#allocation10]  }
  0x39   :  { %s68_s13 = sshll.u32 %s1640_s12, 4  ;;  %s69_s13 = int_to_ptr.vmem [resolvable:$true] %s68_s13 }
  0x3a   :  { %s1571_s14 = scalar_lea.vmem %s69_s13, 2048  ;;  %p1576_p12 = scmp.lt.s32.totalorder %s69_s13, %s69_s13 }
  0x3b   :  { %p1572_p11 = scmp.ne.s32.totalorder %s69_s13, %s1571_s14  ;;  %p1577_p13 = scmp.lt.s32.totalorder %s1571_s14, %s1571_s14 }
  0x3d   :  { %p1578_p0 = por %p1577_p13, %p1576_p12 }
  0x3f   :  { %p1579_p1 = pnand %p1578_p0, %p1572_p11 }
  0x41   :  { %1582 = shalt.err (!%p1579_p1)
}
  0x42   :  { %s1641_s0 = smov 128   ;;  %s1642_s15 = smov 8  }
  0x43   :  { %74 = dma.hbm_to_vmem [thread:$0]  %s1948_s4, 2048, %s69_s13, [#allocation9], %s1641_s0, %s1641_s0, %s1642_s15  }
  0x44   :  { %s1643_s18 = smov [#allocation13]  }
  0x45   :  { %s96_s21 = sshll.u32 %s1643_s18, 4  ;;  %s97_s21 = int_to_ptr.vmem [resolvable:$true] %s96_s21 }
  0x46   :  { %s1591_s2 = scalar_lea.vmem %s97_s21, 1024  ;;  %p1596_p3 = scmp.lt.s32.totalorder %s97_s21, %s97_s21 }
  0x47   :  { %p1592_p2 = scmp.ne.s32.totalorder %s97_s21, %s1591_s2  ;;  %p1597_p4 = scmp.lt.s32.totalorder %s1591_s2, %s1591_s2 }
  0x49   :  { %p1598_p5 = por %p1597_p4, %p1596_p3 }
  0x4b   :  { %p1599_p6 = pnand %p1598_p5, %p1592_p2 }
  0x4d   :  { %1602 = shalt.err (!%p1599_p6)
}
  0x4e   :  { %102 = dma.hbm_to_vmem [thread:$0]  %s1952_s8, 1024, %s97_s21, [#allocation12], %s1636_s19, %s1636_s19, %s1637_s20  }
  0x4f   :  { %1623 = dma.done.wait [#allocation3], 512  }
  0x50   :  { %1624 = vsyncadd [#allocation3], 4294966784 }
  0x51   :  { %1625 = dma.done.wait [#allocation6], 256  }
  0x52   :  { %1626 = vsyncadd [#allocation6], 4294967040 }
  0x53   :  { %1627 = dma.done.wait [#allocation9], 3072  }
  0x54   :  { %1628 = vsyncadd [#allocation9], 4294964224 }
  0x55   :  { %1629 = dma.done.wait [#allocation12], 2048  }
  0x56   :  { %1630 = vsyncadd [#allocation12], 4294965248  ;;  %v1644_v0 = vmov 0.0   ;;  %vm1645_vm0 = vmmov 0   ;;  %v302_v1 = vld [vmem:[#allocation10 + $0x78] sm:$0xff]  ;;  %v301_v3 = vld [vmem:[#allocation10 + $0x70] sm:$0xff]  ;;  %v385_v32 = vlaneseq }
  0x57   :  { %1286 = vmatprep.subr.mxu1 %v1644_v0  ;;  %1318 = vmatprep.mubr.msk.f32.mxu1 %vm1645_vm0, %v1644_v0  ;;  %v1393_v2 = vld [vmem:[#allocation8 + $0x38] sm:$0xff]   ;;  %v300_v4 = vld [vmem:[#allocation10 + $0x68] sm:$0xff]  ;;  %v1394_v5 = vld [vmem:[#allocation8 + $0x30] sm:$0xff]   ;;  %v1646_v30 = vmov 1966171168   ;;  %vm559_vm1 = vcmask 1041409  }
  0x58   :  { %1287 = vmatpush3.msra.mxu1 %v302_v1  ;;  %1262 = vmatprep.subr.bf16.mxu0 %v1393_v2  ;;  %v299_v6 = vld [vmem:[#allocation10 + $0x60] sm:$0xff]  ;;  %v1395_v7 = vld [vmem:[#allocation8 + $0x28] sm:$0xff]   ;;  %v298_v8 = vld [vmem:[#allocation10 + $0x58] sm:$0xff]  ;;  %v383_v31 = vunpack.c.l.s4 %v1646_v30  ;;  %v1779_v34 = vshrl.u32 %v385_v32, 7  ;;  %vm561_vm2 = vcmask 1042434   ;;  %vm563_vm3 = vcmask 1043459  }
  0x59   :  { %1288 = vmatprep.subr.mxu1 %v1644_v0  ;;  %1263 = vmatpush3.bf16.msra.mxu0 %v1393_v2  ;;  %v297_v9 = vld [vmem:[#allocation10 + $0x50] sm:$0xff]  ;;  %v1396_v10 = vld [vmem:[#allocation8 + $0x20] sm:$0xff]   ;;  %v296_v11 = vld [vmem:[#allocation10 + $0x48] sm:$0xff]  ;;  %vm565_vm4 = vcmask 1044484   ;;  %vm567_vm5 = vcmask 1045509   ;;  %vm569_vm6 = vcmask 1046534  }
  0x5a   :  { %1289 = vmatpush3.msra.mxu1 %v301_v3  ;;  %1264 = vmatprep.subr.bf16.mxu0 %v1394_v5  ;;  %v295_v12 = vld [vmem:[#allocation10 + $0x40] sm:$0xff]  ;;  %v1397_v13 = vld [vmem:[#allocation8 + $0x18] sm:$0xff]   ;;  %v1748_v14 = vld [vmem:[#allocation2] sm:$0xff]   ;;  %v384_v33 = vunpack.c.0.s8 %v383_v31  ;;  %v1786_v43 = vsub.s32 0, %v1779_v34  ;;  %vm571_vm7 = vcmask 1047559   ;;  %vm574_vm8 = vcmask 64512  }
  0x5b   :  { %1290 = vmatprep.subr.mxu1 %v1644_v0  ;;  %v294_v15 = vld [vmem:[#allocation10 + $0x38] sm:$0xff]  ;;  %v293_v16 = vld [vmem:[#allocation10 + $0x30] sm:$0xff]  ;;  %v292_v18 = vld [vmem:[#allocation10 + $0x28] sm:$0xff]  ;;  %1278 = vmatprep.mubr.bf16.mxu0 %v1748_v14 }
  0x5c   :  { %1291 = vmatpush3.msra.mxu1 %v300_v4  ;;  %v1398_v17 = vld [vmem:[#allocation8 + $0x10] sm:$0xff]   ;;  %v291_v19 = vld [vmem:[#allocation10 + $0x20] sm:$0xff]  ;;  %v1399_v20 = vld [vmem:[#allocation8 + $0x8] sm:$0xff]   ;;  %v387_v36 = vsub.s32 %v384_v33, %v1779_v34 }
  0x5d   :  { %1292 = vmatprep.subr.mxu1 %v1644_v0  ;;  %1265 = vmatpush3.bf16.msra.mxu0 %v1394_v5  ;;  %v290_v21 = vld [vmem:[#allocation10 + $0x18] sm:$0xff]  ;;  %v289_v22 = vld [vmem:[#allocation10 + $0x10] sm:$0xff]  ;;  %v1400_v23 = vld [vmem:[#allocation8] sm:$0xff]  }
  0x5e   :  { %1293 = vmatpush3.msra.mxu1 %v299_v6  ;;  %1266 = vmatprep.subr.bf16.mxu0 %v1395_v7  ;;  %v288_v24 = vld [vmem:[#allocation10 + $0x8] sm:$0xff]  ;;  %v287_v25 = vld [vmem:[#allocation10] sm:$0xff]  ;;  %v1759_v26 = vld [vmem:[#allocation2 + $0x8] sm:$0xff]  }
  0x5f   :  { %1294 = vmatprep.subr.mxu1 %v1644_v0  ;;  %v1761_v27 = vld [vmem:[#allocation5] sm:$0xff]  ;;  %v1763_v28 = vld [vmem:[#allocation2 + $0x10] sm:$0xff]   ;;  %v1773_v29 = vld [vmem:[#allocation2 + $0x18] sm:$0xff]  }
  0x60   :  { %1295 = vmatpush3.msra.mxu1 %v298_v8  ;;  %v1197_v35 = vld [vmem:[%s1949_s5] ss:$0 sm:$0xff] }
  0x61   :  { %1296 = vmatprep.subr.mxu1 %v1644_v0  ;;  %1267 = vmatpush3.bf16.msra.mxu0 %v1395_v7 }
  0x62   :  { %1297 = vmatpush3.msra.mxu1 %v297_v9  ;;  %1268 = vmatprep.subr.bf16.mxu0 %v1396_v10 }
  0x63   :  { %1298 = vmatprep.subr.mxu1 %v1644_v0 }
  0x64   :  { %1299 = vmatpush3.msra.mxu1 %v296_v11 }
  0x65   :  { %1300 = vmatprep.subr.mxu1 %v1644_v0  ;;  %1269 = vmatpush3.bf16.msra.mxu0 %v1396_v10 }
  0x66   :  { %1301 = vmatpush3.msra.mxu1 %v295_v12  ;;  %1270 = vmatprep.subr.bf16.mxu0 %v1397_v13 }
  0x67   :  { %1302 = vmatprep.subr.mxu1 %v1644_v0 }
  0x68   :  { %1303 = vmatpush3.msra.mxu1 %v294_v15 }
  0x69   :  { %1304 = vmatprep.subr.mxu1 %v1644_v0  ;;  %1271 = vmatpush3.bf16.msra.mxu0 %v1397_v13 }
  0x6a   :  { %1305 = vmatpush3.msra.mxu1 %v293_v16  ;;  %1272 = vmatprep.subr.bf16.mxu0 %v1398_v17  ;;  %v1198_v16 = vld [vmem:[%s1950_s6] ss:$0 sm:$0xff]  ;;  %s1655_s6 = smov [#allocation14]  }
  0x6b   :  { %1306 = vmatprep.subr.mxu1 %v1644_v0  ;;  %s1173_s20 = sshll.u32 %s1655_s6, 4  ;;  %s1174_s20 = int_to_ptr.vmem [resolvable:$true] %s1173_s20 }
  0x6c   :  { %1307 = vmatpush3.msra.mxu1 %v292_v18  ;;  %s1603_s23 = scalar_lea.vmem %s1174_s20, 128  ;;  %p1608_p8 = scmp.lt.s32.totalorder %s1174_s20, %s1174_s20 }
  0x6d   :  { %1308 = vmatprep.subr.mxu1 %v1644_v0  ;;  %1273 = vmatpush3.bf16.msra.mxu0 %v1398_v17  ;;  %p1604_p7 = scmp.ne.s32.totalorder %s1174_s20, %s1603_s23  ;;  %p1609_p9 = scmp.lt.s32.totalorder %s1603_s23, %s1603_s23 }
  0x6e   :  { %1309 = vmatpush3.msra.mxu1 %v291_v19  ;;  %1274 = vmatprep.subr.bf16.mxu0 %v1399_v20 }
  0x6f   :  { %1310 = vmatprep.subr.mxu1 %v1644_v0  ;;  %p1610_p10 = por %p1609_p9, %p1608_p8 }
  0x70   :  { %1311 = vmatpush3.msra.mxu1 %v290_v21 }
  0x71   :  { %1312 = vmatprep.subr.mxu1 %v1644_v0  ;;  %1275 = vmatpush3.bf16.msra.mxu0 %v1399_v20  ;;  %p1611_p11 = pnand %p1610_p10, %p1604_p7 }
  0x72   :  { %1313 = vmatpush3.msra.mxu1 %v289_v22  ;;  %1276 = vmatprep.subr.bf16.mxu0 %v1400_v23 }
  0x73   :  { %1314 = vmatprep.subr.mxu1 %v1644_v0 }
  0x74   :  { %1315 = vmatpush3.msra.mxu1 %v288_v24 }
  0x75   :  { %1316 = vmatprep.subr.mxu1 %v1644_v0  ;;  %1277 = vmatpush3.bf16.msra.mxu0 %v1400_v23 }
  0x76   :  { %1317 = vmatpush3.msra.mxu1 %v287_v25  ;;  %1321 = vmatprep.subr.bf16.mxu0 %v1644_v0 }
  0x77   :  { %1319 = vmatmul.mubr.f32.vlgmr.msra.gmra.mxu1 %v1761_v27  ;;  %1341 = vmatprep.subr.bf16.mxu1 %v1644_v0 }
  0x78   :  { %1357 = vmatprep.mubr.msk.bf16.mxu1 %vm1645_vm0, %v1644_v0  ;;  %1279 = vmatmul.mubr.bf16.vlgmr.msra.gmra.mxu0 %v1759_v26 }
  0x79   :  { %1282 = vmatprep.mubr.bf16.mxu0 %v1763_v28 }
  0x80   :  { %1283 = vmatmul.mubr.bf16.gmra.mxu0 %v1773_v29 }
  0x81   :  { %1337 = vmatprep.mubr.msk.bf16.mxu0 %vm1645_vm0, %v1644_v0 }
 0x137   :  { %v376_v37 = vpop.f32.mrf.mxu1 }
 0x138   :  { %v377_v38 = vadd.f32 %v1197_v35, %v376_v37  ;;  %v1280_v42 = vpop.f32.mrf.mxu0 }
 0x139   :  { %v1320_v39 = vpop.f32.mrf.mxu1 }
 0x13a   :  { %v381_v40 = vcombine.high %v377_v38, %v377_v38  ;;  %v388_v41 = vrot.slane %v377_v38, %v387_v36  ;;  %v256_v47 = vpop.f32.mrf.mxu0  ;;  %v1800_v39 = vand.u32 127, %v385_v32 }
 0x13c   :  { %v395_v44 = vrot.slane %v381_v40, %v387_v36  ;;  %v396_v45 = vcombine.high %v388_v41, %v388_v41  ;;  %v404_v46 = vrot.slane %v388_v41, %v387_v36  ;;  %v1281_v51 = vpop.f32.mrf.mxu0  ;;  %v1804_v41 = vsub.s32 %v1800_v39, %v1779_v34 }
 0x13d   :  { %vm1115_vm9 = vcmp.ge.s32.totalorder %v1800_v39, 64 }
 0x13e   :  { %v397_v48 = vcombine.high %v395_v44, %v395_v44  ;;  %v426_v49 = vcombine.high %v404_v46, %v404_v46  ;;  %v433_v50 = vrot.slane %v404_v46, %v1786_v43  ;;  %v418_v52 = vrot.slane %v396_v45, %v387_v36  ;;  %v259_v57 = vpop.f32.mrf.mxu0 }
 0x13f   :  { %v411_v53 = vrot.slane %v395_v44, %v387_v36 }
 0x140   :  { %v441_v54 = vrot.slane %v426_v49, %v1786_v43  ;;  %v470_v55 = vadd.f32 %v433_v50, %v256_v47  ;;  %v428_v56 = vcombine.high %v418_v52, %v418_v52  ;;  %v437_v58 = vrot.slane %v418_v52, %v1786_v43  ;;  %v1284_v1 = vpop.f32.mrf.mxu0 }
 0x141   :  { %v427_v59 = vcombine.high %v411_v53, %v411_v53  ;;  %v425_v60 = vrot.slane %v397_v48, %v387_v36  ;;  %v449_v2 = vrot.slane %v411_v53, %v1786_v43 }
 0x142   :  { %v472_v61 = vadd.f32 %v1280_v42, %v441_v54  ;;  %1425 = vtanh.f32 %v470_v55  ;;  %v445_v62 = vrot.slane %v428_v56, %v1786_v43  ;;  %v471_v63 = vadd.f32 %v437_v58, %v259_v57  ;;  %v272_v6 = vpop.f32.mrf.mxu0 }
 0x143   :  { %v429_v3 = vcombine.high %v425_v60, %v425_v60  ;;  %v457_v5 = vrot.slane %v427_v59, %v1786_v43  ;;  %v474_v7 = vadd.f32 %v449_v2, %v272_v6  ;;  %v453_v10 = vrot.slane %v425_v60, %v1786_v43 }
 0x144   :  { %1427 = vtanh.f32 %v472_v61  ;;  %v473_v4 = vadd.f32 %v1281_v51, %v445_v62  ;;  %v1285_v8 = vpop.f32.mrf.mxu0  ;;  %v1647_v2 = vmov 0  }
 0x145   :  { %1429 = vtanh.f32 %v471_v63  ;;  %v461_v9 = vrot.slane %v429_v3, %v1786_v43  ;;  %v476_v11 = vadd.f32 %v1284_v1, %v457_v5  ;;  %1385 = vset.pattern.permute.xlu0 %v1647_v2  ;;  %1384 = vset.pattern.permute.xlu1 %v1647_v2  ;;  %v585_v3 = vsub.s32 1, %v1779_v34 }
 0x146   :  { %1431 = vtanh.f32 %v473_v4  ;;  %v275_v12 = vpop.f32.mrf.mxu0  ;;  %v589_v4 = vsub.s32 2, %v1779_v34  ;;  %v593_v5 = vsub.s32 3, %v1779_v34 }
 0x147   :  { %1433 = vtanh.f32 %v474_v7  ;;  %v475_v13 = vadd.f32 %v453_v10, %v275_v12  ;;  %v477_v15 = vadd.f32 %v1285_v8, %v461_v9  ;;  %v597_v10 = vsub.s32 4, %v1779_v34 }
 0x149   :  { %1435 = vtanh.f32 %v475_v13 }
 0x14a   :  { %1437 = vtanh.f32 %v476_v11 }
 0x14b   :  { %1439 = vtanh.f32 %v477_v15 }
 0x14f   :  { %v1426_v17 = vpop.eup %1425 }
 0x150   :  { %v493_v18 = vmul.f32 %v1426_v17, %v1198_v16 }
 0x151   :  { %v1428_v19 = vpop.eup %1427 }
 0x152   :  { %v1430_v20 = vpop.eup %1429  ;;  %501 = vadd.xlane.f32.xlu0 %v493_v18  ;;  %v495_v21 = vmul.f32 %v1428_v19, %v1198_v16  ;;  %v601_v18 = vsub.s32 5, %v1779_v34 }
 0x153   :  { %v1432_v22 = vpop.eup %1431  ;;  %v494_v23 = vmul.f32 %v1430_v20, %v1198_v16 }
 0x154   :  { %505 = vadd.xlane.f32.xlu1 %v495_v21  ;;  %v1434_v24 = vpop.eup %1433  ;;  %v496_v25 = vmul.f32 %v1432_v22, %v1198_v16  ;;  %v605_v22 = vsub.s32 6, %v1779_v34 }
 0x155   :  { %v497_v31 = vmul.f32 %v1434_v24, %v1198_v16 }
 0x156   :  { %503 = vadd.xlane.f32.xlu0 %v494_v23  ;;  %v1436_v30 = vpop.eup %1435 }
 0x157   :  { %v1438_v33 = vpop.eup %1437  ;;  %v498_v35 = vmul.f32 %v1436_v30, %v1198_v16  ;;  %v609_v30 = vsub.s32 7, %v1779_v34  ;;  %v1412_v34 = vld [vmem:[#allocation13 + $0x18] sm:$0xff]  }
 0x158   :  { %507 = vadd.xlane.f32.xlu1 %v496_v25  ;;  %v1440_v36 = vpop.eup %1439  ;;  %v499_v37 = vmul.f32 %v1438_v33, %v1198_v16 }
 0x159   :  { %v500_v38 = vmul.f32 %v1440_v36, %v1198_v16 }
 0x15a   :  { %509 = vadd.xlane.f32.xlu0 %v497_v31 }
 0x15c   :  { %511 = vadd.xlane.f32.xlu1 %v498_v35 }
 0x15e   :  { %513 = vadd.xlane.f32.xlu0 %v499_v37 }
 0x160   :  { %515 = vadd.xlane.f32.xlu1 %v500_v38 }
 0x1db   :  { %v502_v40 = vpop.xlane.xlu0 %501 }
 0x1dc   :  { %v530_v45 = vrot.slane %v502_v40, %v1804_v41 }
 0x1dd   :  { %v506_v42 = vpop.xlane.xlu1 %505 }
 0x1de   :  { %v538_v47 = vrot.slane %v506_v42, %v1804_v41 }
 0x1df   :  { %v504_v44 = vpop.xlane.xlu0 %503 }
 0x1e0   :  { %v534_v46 = vrot.slane %v504_v44, %v1804_v41 }
 0x1e1   :  { %v508_v48 = vpop.xlane.xlu1 %507 }
 0x1e2   :  { %v560_v32 = vsel %vm559_vm1, %v534_v46, %v530_v45  ;;  %v542_v49 = vrot.slane %v508_v48, %v1804_v41 }
 0x1e3   :  { %v562_v50 = vsel %vm561_vm2, %v538_v47, %v560_v32  ;;  %v510_v51 = vpop.xlane.xlu0 %509 }
 0x1e4   :  { %v564_v52 = vsel %vm563_vm3, %v542_v49, %v562_v50  ;;  %v546_v53 = vrot.slane %v510_v51, %v1804_v41 }
 0x1e5   :  { %v512_v54 = vpop.xlane.xlu1 %511 }
 0x1e6   :  { %v566_v55 = vsel %vm565_vm4, %v546_v53, %v564_v52  ;;  %v550_v56 = vrot.slane %v512_v54, %v1804_v41 }
 0x1e7   :  { %v514_v57 = vpop.xlane.xlu0 %513 }
 0x1e8   :  { %v554_v58 = vrot.slane %v514_v57, %v1804_v41  ;;  %v568_v59 = vsel %vm567_vm5, %v550_v56, %v566_v55 }
 0x1e9   :  { %v516_v60 = vpop.xlane.xlu1 %515 }
 0x1ea   :  { %v558_v61 = vrot.slane %v516_v60, %v1804_v41  ;;  %v570_v62 = vsel %vm569_vm6, %v554_v58, %v568_v59 }
 0x1ec   :  { %v572_v63 = vsel %vm571_vm7, %v558_v61, %v570_v62 }
 0x1ed   :  { %v575_v1 = vsel %vm574_vm8, %v572_v63, -inf }
 0x1ee   :  { %576 = vmax.xlane.f32.xlu0 %v575_v1 }
 0x277   :  { %v577_v6 = vpop.xlane.xlu0 %576 }
 0x278   :  { %v582_v7 = vrot.slane %v577_v6, %v1786_v43  ;;  %v586_v8 = vrot.slane %v577_v6, %v585_v3  ;;  %v590_v9 = vrot.slane %v577_v6, %v589_v4  ;;  %v594_v11 = vrot.slane %v577_v6, %v593_v5 }
 0x279   :  { %v598_v19 = vrot.slane %v577_v6, %v597_v10  ;;  %v602_v23 = vrot.slane %v577_v6, %v601_v18  ;;  %v606_v31 = vrot.slane %v577_v6, %v605_v22  ;;  %v610_v36 = vrot.slane %v577_v6, %v609_v30 }
 0x27a   :  { %v619_v12 = vsub.f32 %v502_v40, %v582_v7  ;;  %v620_v13 = vsub.f32 %v504_v44, %v586_v8  ;;  %v621_v15 = vsub.f32 %v506_v42, %v590_v9  ;;  %v622_v20 = vsub.f32 %v508_v48, %v594_v11 }
 0x27b   :  { %v623_v24 = vsub.f32 %v510_v51, %v598_v19  ;;  %v624_v33 = vsub.f32 %v512_v54, %v602_v23  ;;  %v625_v37 = vsub.f32 %v514_v57, %v606_v31  ;;  %v626_v44 = vsub.f32 %v516_v60, %v610_v36  ;;  %v1872_v19 = vld [vmem:[#allocation7] sm:$0xff] }
 0x27c   :  { %v627_v16 = vmul.f32 1.442695, %v619_v12  ;;  %v629_v17 = vmul.f32 1.442695, %v620_v13  ;;  %v631_v21 = vmul.f32 1.442695, %v621_v15 }
 0x27d   :  { %v633_v25 = vmul.f32 1.442695, %v622_v20  ;;  %v635_v35 = vmul.f32 1.442695, %v623_v24  ;;  %v637_v38 = vmul.f32 1.442695, %v624_v33 }
 0x27e   :  { %1441 = vpow2.f32 %v627_v16  ;;  %v639_v45 = vmul.f32 1.442695, %v625_v37  ;;  %v641_v47 = vmul.f32 1.442695, %v626_v44  ;;  %v1648_v20 = vmov 3  }
 0x27f   :  { %1443 = vpow2.f32 %v629_v17 }
 0x280   :  { %1445 = vpow2.f32 %v631_v21  ;;  %v1649_v21 = vmov 5  }
 0x281   :  { %1447 = vpow2.f32 %v633_v25 }
 0x282   :  { %1449 = vpow2.f32 %v635_v35 }
 0x283   :  { %1451 = vpow2.f32 %v637_v38 }
 0x284   :  { %1453 = vpow2.f32 %v639_v45 }
 0x285   :  { %1455 = vpow2.f32 %v641_v47 }
 0x28b   :  { %v1442_v40 = vpop.eup %1441 }
 0x28c   :  { %v1844_v42 = vpop.eup %1443  ;;  %652 = vperm.xlu1 %1384, %v1442_v40  }
 0x28d   :  { %655 = vperm.xlu0 %1385, %v1844_v42   ;;  %v1446_v46 = vpop.eup %1445 }
 0x28e   :  { %v1448_v48 = vpop.eup %1447 }
 0x28f   :  { %v1450_v32 = vpop.eup %1449 }
 0x290   :  { %658 = vperm.xlu1 %1384, %v1446_v46   ;;  %v1847_v49 = vpop.eup %1451 }
 0x291   :  { %v1850_v50 = vpop.eup %1453 }
 0x292   :  { %v1853_v51 = vpop.eup %1455 }
 0x294   :  { %661 = vperm.xlu1 %1384, %v1448_v48  }
 0x298   :  { %664 = vperm.xlu1 %1384, %v1450_v32  }
 0x29c   :  { %667 = vperm.xlu1 %1384, %v1847_v49  }
 0x2a0   :  { %670 = vperm.xlu1 %1384, %v1850_v50  }
 0x2a4   :  { %673 = vperm.xlu1 %1384, %v1853_v51  }
 0x307   :  { %v653_v52 = vpop.permute.xlu1 %652 }
 0x308   :  { %v656_v56 = vpop.permute.xlu0 %655  ;;  %v678_v59 = vrot.slane %v653_v52, %v1804_v41  ;;  %v1415_v52 = vld [vmem:[#allocation11 + $0x18] sm:$0xff]  }
 0x309   :  { %v682_v58 = vrot.slane %v656_v56, %v1804_v41  ;;  %v1418_v56 = vld [vmem:[#allocation13] sm:$0xff]  }
 0x30b   :  { %v659_v53 = vpop.permute.xlu1 %658  ;;  %v707_v1 = vsel %vm559_vm1, %v682_v58, %v678_v59  ;;  %v896_v58 = vpack.c.bf16 %v1761_v27, %v1761_v27  ;;  %v1653_v59 = vmov 4   ;;  %v769_v27 = vunpack.c.h.bf16 %v1748_v14 }
 0x30c   :  { %v686_v60 = vrot.slane %v659_v53, %v1804_v41  ;;  %v1652_v53 = vmov 2  }
 0x30e   :  { %v708_v6 = vsel %vm561_vm2, %v686_v60, %v707_v1  ;;  %v1420_v60 = vld [vmem:[#allocation11] sm:$0xff]  }
 0x30f   :  { %v662_v54 = vpop.permute.xlu1 %661 }
 0x310   :  { %v690_v61 = vrot.slane %v662_v54, %v1804_v41  ;;  %v1416_v54 = vld [vmem:[#allocation13 + $0x8] sm:$0xff]  }
 0x312   :  { %v709_v8 = vsel %vm563_vm3, %v690_v61, %v708_v6  ;;  %v1654_v61 = vmov 7   ;;  %v770_v6 = vunpack.c.l.bf16 %v1759_v26 }
 0x313   :  { %v665_v55 = vpop.permute.xlu1 %664 }
 0x314   :  { %v694_v62 = vrot.slane %v665_v55, %v1804_v41  ;;  %v1417_v55 = vld [vmem:[#allocation11 + $0x10] sm:$0xff]  }
 0x316   :  { %v710_v9 = vsel %vm565_vm4, %v694_v62, %v709_v8 }
 0x317   :  { %v668_v57 = vpop.permute.xlu1 %667 }
 0x318   :  { %v698_v2 = vrot.slane %v668_v57, %v1804_v41  ;;  %v1419_v57 = vld [vmem:[#allocation11 + $0x8] sm:$0xff]  }
 0x31a   :  { %v711_v12 = vsel %vm567_vm5, %v698_v2, %v710_v9 }
 0x31b   :  { %v671_v63 = vpop.permute.xlu1 %670 }
 0x31c   :  { %v702_v7 = vrot.slane %v671_v63, %v1804_v41  ;;  %v768_v63 = vunpack.c.l.bf16 %v1748_v14 }
 0x31e   :  { %v712_v15 = vsel %vm569_vm6, %v702_v7, %v711_v12 }
 0x31f   :  { %v674_v11 = vpop.permute.xlu1 %673 }
 0x320   :  { %v706_v13 = vrot.slane %v674_v11, %v1804_v41  ;;  %v1650_v41 = vmov 6  }
 0x322   :  { %v713_v16 = vsel %vm571_vm7, %v706_v13, %v712_v15 }
 0x323   :  { %v715_v17 = vsel %vm574_vm8, %v713_v16, 0.0 }
 0x324   :  { %716 = vadd.xlane.f32.xlu1 %v715_v17 }
 0x335   :  { %1117 = vperm.xlu1 %1384, %v1872_v19  }
 0x339   :  { %1388 = vset.pattern.permute.xlu1 %v1648_v20 }
 0x33a   :  { %1132 = vperm.xlu1 %1388, %v1872_v19  }
 0x33e   :  { %1390 = vset.pattern.permute.xlu1 %v1649_v21  ;;  %v772_v21 = vunpack.c.l.bf16 %v1763_v28 }
 0x33f   :  { %1142 = vperm.xlu1 %1390, %v1872_v19  }
 0x343   :  { %1391 = vset.pattern.permute.xlu1 %v1650_v41 }
 0x344   :  { %1147 = vperm.xlu1 %1391, %v1872_v19  }
 0x3ad   :  { %v717_v23 = vpop.xlane.xlu1 %716 }
 0x3ae   :  { %1457 = vrcp.f32 %v717_v23 }
 0x3bb   :  { %v1458_v24 = vpop.eup %1457 }
 0x3bc   :  { %v723_v25 = vrot.slane %v1458_v24, %v1786_v43  ;;  %v727_v33 = vrot.slane %v1458_v24, %v585_v3  ;;  %v731_v36 = vrot.slane %v1458_v24, %v589_v4  ;;  %v735_v38 = vrot.slane %v1458_v24, %v593_v5  ;;  %v1406_v4 = vld [vmem:[#allocation13 + $0x30] sm:$0xff]  }
 0x3bd   :  { %v739_v43 = vrot.slane %v1458_v24, %v597_v10  ;;  %v743_v3 = vrot.slane %v1458_v24, %v601_v18  ;;  %v747_v5 = vrot.slane %v1458_v24, %v605_v22  ;;  %v1408_v10 = vld [vmem:[#allocation13 + $0x28] sm:$0xff]   ;;  %v751_v18 = vrot.slane %v1458_v24, %v609_v30  ;;  %v1410_v22 = vld [vmem:[#allocation13 + $0x20] sm:$0xff]  }
 0x3be   :  { %v760_v31 = vmul.f32 %v1442_v40, %v723_v25  ;;  %v761_v35 = vmul.f32 %v1844_v42, %v727_v33  ;;  %v762_v37 = vmul.f32 %v1446_v46, %v731_v36  ;;  %v763_v44 = vmul.f32 %v1448_v48, %v735_v38  ;;  %v1405_v40 = vld [vmem:[#allocation13 + $0x38] sm:$0xff]   ;;  %v1409_v48 = vld [vmem:[#allocation11 + $0x30] sm:$0xff]   ;;  %v1413_v30 = vld [vmem:[#allocation11 + $0x20] sm:$0xff]  }
 0x3bf   :  { %v764_v45 = vmul.f32 %v1450_v32, %v739_v43  ;;  %1322 = vmatpush3.bf16.msra.mxu0 %v1405_v40  ;;  %v765_v42 = vmul.f32 %v1847_v49, %v743_v3  ;;  %v1407_v46 = vld [vmem:[#allocation11 + $0x38] sm:$0xff]   ;;  %v766_v47 = vmul.f32 %v1850_v50, %v747_v5  ;;  %v767_v32 = vmul.f32 %v1853_v51, %v751_v18  ;;  %v1411_v49 = vld [vmem:[#allocation11 + $0x28] sm:$0xff]   ;;  %v1414_v51 = vld [vmem:[#allocation13 + $0x10] sm:$0xff]  }
 0x3c0   :  { %778 = vperm.xlu0 %1385, %v760_v31   ;;  %1323 = vmatprep.subr.bf16.mxu0 %v1644_v0  ;;  %v1651_v50 = vmov 1   ;;  %v773_v25 = vunpack.c.h.bf16 %v1763_v28  ;;  %v774_v43 = vunpack.c.l.bf16 %v1773_v29  ;;  %v775_v18 = vunpack.c.h.bf16 %v1773_v29 }
 0x3c1   :  { %1342 = vmatpush3.bf16.msra.mxu1 %v1407_v46 }
 0x3c2   :  { %1343 = vmatprep.subr.bf16.mxu1 %v1644_v0 }
 0x3c3   :  { %1324 = vmatpush3.bf16.msra.mxu0 %v1406_v4 }
 0x3c4   :  { %783 = vperm.xlu0 %1385, %v761_v35   ;;  %1325 = vmatprep.subr.bf16.mxu0 %v1644_v0 }
 0x3c5   :  { %1344 = vmatpush3.bf16.msra.mxu1 %v1409_v48 }
 0x3c6   :  { %1345 = vmatprep.subr.bf16.mxu1 %v1644_v0 }
 0x3c7   :  { %1326 = vmatpush3.bf16.msra.mxu0 %v1408_v10 }
 0x3c8   :  { %788 = vperm.xlu0 %1385, %v762_v37   ;;  %1327 = vmatprep.subr.bf16.mxu0 %v1644_v0 }
 0x3c9   :  { %1346 = vmatpush3.bf16.msra.mxu1 %v1411_v49 }
 0x3ca   :  { %1347 = vmatprep.subr.bf16.mxu1 %v1644_v0 }
 0x3cb   :  { %1328 = vmatpush3.bf16.msra.mxu0 %v1410_v22 }
 0x3cc   :  { %793 = vperm.xlu0 %1385, %v763_v44   ;;  %1329 = vmatprep.subr.bf16.mxu0 %v1644_v0 }
 0x3cd   :  { %1348 = vmatpush3.bf16.msra.mxu1 %v1413_v30 }
 0x3ce   :  { %1349 = vmatprep.subr.bf16.mxu1 %v1644_v0 }
 0x3cf   :  { %1330 = vmatpush3.bf16.msra.mxu0 %v1412_v34 }
 0x3d0   :  { %798 = vperm.xlu0 %1385, %v764_v45   ;;  %1331 = vmatprep.subr.bf16.mxu0 %v1644_v0 }
 0x3d1   :  { %1350 = vmatpush3.bf16.msra.mxu1 %v1415_v52 }
 0x3d2   :  { %1351 = vmatprep.subr.bf16.mxu1 %v1644_v0 }
 0x3d3   :  { %1332 = vmatpush3.bf16.msra.mxu0 %v1414_v51 }
 0x3d4   :  { %803 = vperm.xlu0 %1385, %v765_v42   ;;  %1333 = vmatprep.subr.bf16.mxu0 %v1644_v0 }
 0x3d5   :  { %1352 = vmatpush3.bf16.msra.mxu1 %v1417_v55 }
 0x3d6   :  { %1353 = vmatprep.subr.bf16.mxu1 %v1644_v0 }
 0x3d7   :  { %1334 = vmatpush3.bf16.msra.mxu0 %v1416_v54 }
 0x3d8   :  { %808 = vperm.xlu0 %1385, %v766_v47   ;;  %1335 = vmatprep.subr.bf16.mxu0 %v1644_v0 }
 0x3d9   :  { %1354 = vmatpush3.bf16.msra.mxu1 %v1419_v57 }
 0x3da   :  { %1355 = vmatprep.subr.bf16.mxu1 %v1644_v0  ;;  %v771_v0 = vunpack.c.h.bf16 %v1759_v26 }
 0x3db   :  { %1336 = vmatpush3.bf16.msra.mxu0 %v1418_v56 }
 0x3dc   :  { %813 = vperm.xlu0 %1385, %v767_v32  }
 0x3dd   :  { %1356 = vmatpush3.bf16.msra.mxu1 %v1420_v60 }
 0x3de   :  { %1338 = vmatmul.mubr.bf16.vlgmr.msra.gmra.mxu0 %v896_v58 }
 0x3e0   :  { %1386 = vset.pattern.permute.xlu0 %v1651_v50 }
 0x3e1   :  { %1122 = vperm.xlu0 %1386, %v1872_v19  }
 0x3e5   :  { %1387 = vset.pattern.permute.xlu0 %v1652_v53 }
 0x3e6   :  { %1127 = vperm.xlu0 %1387, %v1872_v19  }
 0x3ea   :  { %1389 = vset.pattern.permute.xlu0 %v1653_v59 }
 0x3eb   :  { %1137 = vperm.xlu0 %1389, %v1872_v19  }
 0x3ef   :  { %1392 = vset.pattern.permute.xlu0 %v1654_v61 }
 0x3f0   :  { %1152 = vperm.xlu0 %1392, %v1872_v19  }
 0x43b   :  { %v779_v62 = vpop.permute.xlu0 %778 }
 0x43c   :  { %v816_v7 = vmul.f32 %v779_v62, %v768_v63 }
 0x43e   :  { %v824_v12 = vrot.slane %v816_v7, 4 }
 0x43f   :  { %v784_v1 = vpop.permute.xlu0 %783 }
 0x440   :  { %v817_v2 = vmul.f32 %v784_v1, %v769_v27  ;;  %v825_v19 = vadd.f32 %v824_v12, %v816_v7 }
 0x442   :  { %v830_v9 = vrot.slane %v817_v2, 4  ;;  %v826_v31 = vrot.slane %v825_v19, 2 }
 0x443   :  { %v789_v8 = vpop.permute.xlu0 %788 }
 0x444   :  { %v818_v11 = vmul.f32 %v789_v8, %v770_v6  ;;  %v831_v16 = vadd.f32 %v830_v9, %v817_v2  ;;  %v827_v40 = vadd.f32 %v826_v31, %v825_v19 }
 0x446   :  { %v836_v13 = vrot.slane %v818_v11, 4  ;;  %v832_v23 = vrot.slane %v831_v16, 2  ;;  %v828_v48 = vrot.slane %v827_v40, 1 }
 0x447   :  { %v794_v15 = vpop.permute.xlu0 %793 }
 0x448   :  { %v819_v17 = vmul.f32 %v794_v15, %v771_v0  ;;  %v837_v20 = vadd.f32 %v836_v13, %v818_v11  ;;  %v833_v38 = vadd.f32 %v832_v23, %v831_v16  ;;  %v829_v56 = vadd.f32 %v828_v48, %v827_v40 }
 0x44a   :  { %v842_v14 = vrot.slane %v819_v17, 4  ;;  %v838_v33 = vrot.slane %v837_v20, 2  ;;  %v834_v10 = vrot.slane %v833_v38, 1  ;;  %v872_v6 = vpack.c.bf16 %v829_v56, %v829_v56 }
 0x44b   :  { %v799_v41 = vpop.permute.xlu0 %798 }
 0x44c   :  { %v843_v24 = vadd.f32 %v842_v14, %v819_v17  ;;  %v820_v35 = vmul.f32 %v799_v41, %v772_v21  ;;  %v839_v45 = vadd.f32 %v838_v33, %v837_v20  ;;  %v835_v52 = vadd.f32 %v834_v10, %v833_v38 }
 0x44d   :  { %v1009_v17 = vunpack.c.l.b16 %v872_v6 }
 0x44e   :  { %v844_v36 = vrot.slane %v843_v24, 2  ;;  %v848_v26 = vrot.slane %v820_v35, 4  ;;  %v840_v22 = vrot.slane %v839_v45, 1  ;;  %v873_v29 = vpack.c.bf16 %v835_v52, %v835_v52 }
 0x44f   :  { %v804_v37 = vpop.permute.xlu0 %803 }
 0x450   :  { %v821_v44 = vmul.f32 %v804_v37, %v773_v25  ;;  %v849_v3 = vadd.f32 %v848_v26, %v820_v35  ;;  %v845_v4 = vadd.f32 %v844_v36, %v843_v24  ;;  %v841_v57 = vadd.f32 %v840_v22, %v839_v45 }
 0x451   :  { %v1010_v0 = vunpack.c.l.b16 %v873_v29 }
 0x452   :  { %v854_v42 = vrot.slane %v821_v44, 4  ;;  %v850_v5 = vrot.slane %v849_v3, 2  ;;  %v846_v49 = vrot.slane %v845_v4, 1  ;;  %v874_v2 = vpack.c.bf16 %v841_v57, %v841_v57 }
 0x453   :  { %v809_v46 = vpop.permute.xlu0 %808  ;;  %v1017_v41 = vsel %vm559_vm1, %v1010_v0, %v1009_v17 }
 0x454   :  { %v855_v47 = vadd.f32 %v854_v42, %v821_v44  ;;  %v822_v28 = vmul.f32 %v809_v46, %v774_v43  ;;  %v851_v32 = vadd.f32 %v850_v5, %v849_v3  ;;  %v847_v58 = vadd.f32 %v846_v49, %v845_v4  ;;  %v1118_v5 = vpop.permute.xlu1 %1117 }
 0x455   :  { %v1011_v16 = vunpack.c.l.b16 %v874_v2  ;;  %vm1119_vm10 = vcmp.eq.s32.totalorder %v1800_v39, %v1118_v5 }
 0x456   :  { %v856_v34 = vrot.slane %v855_v47, 2  ;;  %v860_v30 = vrot.slane %v822_v28, 4  ;;  %v852_v50 = vrot.slane %v851_v32, 1  ;;  %v875_v7 = vpack.c.bf16 %v847_v58, %v847_v58  ;;  %vm1120_vm13 = vmor %vm1115_vm9, %vm1119_vm10 }
 0x457   :  { %v814_v51 = vpop.permute.xlu0 %813  ;;  %v1018_v25 = vsel %vm561_vm2, %v1011_v16, %v1017_v41 }
 0x458   :  { %v857_v53 = vadd.f32 %v856_v34, %v855_v47  ;;  %v861_v54 = vadd.f32 %v860_v30, %v822_v28  ;;  %v823_v55 = vmul.f32 %v814_v51, %v775_v18  ;;  %v853_v62 = vadd.f32 %v852_v50, %v851_v32  ;;  %v1133_v46 = vpop.permute.xlu1 %1132 }
 0x459   :  { %v1012_v19 = vunpack.c.l.b16 %v875_v7  ;;  %vm1134_vm15 = vcmp.eq.s32.totalorder %v1800_v39, %v1133_v46 }
 0x45a   :  { %v858_v59 = vrot.slane %v857_v53, 1  ;;  %v862_v60 = vrot.slane %v861_v54, 2  ;;  %v866_v61 = vrot.slane %v823_v55, 4  ;;  %v876_v11 = vpack.c.bf16 %v853_v62, %v853_v62 }
 0x45b   :  { %v1019_v33 = vsel %vm563_vm3, %v1012_v19, %v1018_v25 }
 0x45c   :  { %v859_v27 = vadd.f32 %v858_v59, %v857_v53  ;;  %v863_v63 = vadd.f32 %v862_v60, %v861_v54  ;;  %v867_v1 = vadd.f32 %v866_v61, %v823_v55  ;;  %v1013_v14 = vunpack.c.l.b16 %v876_v11  ;;  %v1123_v42 = vpop.permute.xlu0 %1122  ;;  %v1143_v47 = vpop.permute.xlu1 %1142 }
 0x45d   :  { %vm1124_vm11 = vcmp.eq.s32.totalorder %v1800_v39, %v1123_v42  ;;  %vm1144_vm3 = vcmp.eq.s32.totalorder %v1800_v39, %v1143_v47 }
 0x45e   :  { %v864_v8 = vrot.slane %v863_v63, 1  ;;  %v868_v9 = vrot.slane %v867_v1, 2  ;;  %v877_v12 = vpack.c.bf16 %v859_v27, %v859_v27  ;;  %v1020_v36 = vsel %vm565_vm4, %v1013_v14, %v1019_v33  ;;  %vm1125_vm14 = vmor %vm1120_vm13, %vm1124_vm11 }
 0x460   :  { %v865_v13 = vadd.f32 %v864_v8, %v863_v63  ;;  %v869_v15 = vadd.f32 %v868_v9, %v867_v1  ;;  %v1014_v23 = vunpack.c.l.b16 %v877_v12  ;;  %v1148_v18 = vpop.permute.xlu1 %1147 }
 0x461   :  { %v1128_v10 = vpop.permute.xlu0 %1127 }
 0x462   :  { %v878_v20 = vpack.c.bf16 %v865_v13, %v865_v13  ;;  %v870_v21 = vrot.slane %v869_v15, 1  ;;  %v1021_v26 = vsel %vm567_vm5, %v1014_v23, %v1020_v36  ;;  %vm1129_vm12 = vcmp.eq.s32.totalorder %v1800_v39, %v1128_v10 }
 0x463   :  { %vm1130_vm0 = vmor %vm1125_vm14, %vm1129_vm12 }
 0x464   :  { %v871_v24 = vadd.f32 %v870_v21, %v869_v15  ;;  %v1015_v31 = vunpack.c.l.b16 %v878_v20  ;;  %vm1135_vm2 = vmor %vm1130_vm0, %vm1134_vm15 }
 0x466   :  { %v879_v35 = vpack.c.bf16 %v871_v24, %v871_v24  ;;  %v1022_v38 = vsel %vm569_vm6, %v1015_v31, %v1021_v26  ;;  %v1138_v28 = vpop.permute.xlu0 %1137  ;;  %vm1149_vm6 = vcmp.eq.s32.totalorder %v1800_v39, %v1148_v18 }
 0x467   :  { %vm1139_vm1 = vcmp.eq.s32.totalorder %v1800_v39, %v1138_v28 }
 0x468   :  { %v1016_v37 = vunpack.c.l.b16 %v879_v35  ;;  %vm1140_vm4 = vmor %vm1135_vm2, %vm1139_vm1 }
 0x469   :  { %vm1145_vm5 = vmor %vm1140_vm4, %vm1144_vm3 }
 0x46a   :  { %v1023_v44 = vsel %vm571_vm7, %v1016_v37, %v1022_v38  ;;  %vm1150_vm8 = vmor %vm1145_vm5, %vm1149_vm6 }
 0x46b   :  { %v1024_v43 = vpack.c.b16 %v1023_v44, %v1023_v44  ;;  %v1153_v48 = vpop.permute.xlu0 %1152 }
 0x46c   :  { %vm1154_vm7 = vcmp.eq.s32.totalorder %v1800_v39, %v1153_v48 }
 0x46d   :  { %1358 = vmatmul.mubr.bf16.vlgmr.msra.gmra.mxu1 %v1024_v43  ;;  %vm1155_vm9 = vmor %vm1150_vm8, %vm1154_vm7 }
 0x49e   :  { %v995_v40 = vpop.f32.mrf.mxu0 }
 0x4a0   :  { %v1339_v45 = vpop.f32.mrf.mxu0 }
 0x4a2   :  { %v998_v3 = vpop.f32.mrf.mxu0 }
 0x4a4   :  { %v1340_v4 = vpop.f32.mrf.mxu0 }
 0x52d   :  { %v1108_v22 = vpop.f32.mrf.mxu1 }
 0x52e   :  { %v1109_v32 = vadd.f32 %v1108_v22, %v995_v40 }
 0x52f   :  { %v1359_v49 = vpop.f32.mrf.mxu1 }
 0x530   :  { %v1156_v34 = vsel %vm1155_vm9, -inf, %v1109_v32 }
 0x531   :  { %v1111_v30 = vpop.f32.mrf.mxu1  ;;  %1157 = vmax.xlane.f32.xlu1 %v1156_v34 }
 0x533   :  { %v1360_v50 = vpop.f32.mrf.mxu1 }
 0x5ba   :  { %v1158_v51 = vpop.xlane.xlu1 %1157 }
 0x5bb   :  { %v1159_v52 = vsub.f32 %v1156_v34, %v1158_v51 }
 0x5bd   :  { %v1160_v53 = vmul.f32 1.442695, %v1159_v52 }
 0x5bf   :  { %1459 = vpow2.f32 %v1160_v53 }
 0x5cc   :  { %v1460_v54 = vpop.eup %1459 }
 0x5cd   :  { %1162 = vadd.xlane.f32.xlu0 %v1460_v54 }
 0x656   :  { %v1163_v55 = vpop.xlane.xlu0 %1162 }
 0x657   :  { %1461 = vrcp.f32 %v1163_v55 }
 0x664   :  { %v1462_v39 = vpop.eup %1461 }
 0x665   :  { %v1165_v56 = vmul.f32 %v1462_v39, %v1460_v54 }
 0x667   :  { %1166 = vst [vmem:[#allocation14] sm:$0xff] %v1165_v56 }
 0x668   :  { %1614 = shalt.err (!%p1611_p11)
}
 0x669   :  { %1176 = dma.vmem_to_hbm [thread:$0]  %s1174_s20, 128, %s1953_s9, [#allocation4]  }
 0x66a   :  { %1631 = dma.done.wait [#allocation4], 128  }
 0x66b   :  { %1632 = vsyncadd [#allocation4], 4294967168 }
 0x66c   :  { %1180 = vsyncpa [#allocation3], 1 }
 0x66d   :  { %1181 = vsyncpa [#allocation6], 1 }
 0x66e   :  { %1182 = vsyncpa [#allocation9], 1 }
 0x66f   :  { %1183 = vsyncpa [#allocation12], 1 }
 0x670   :  { %1184 = vsyncpa [#allocation4], 1 }

// kernel: tpu_custom_call.1
= control target key start
LH: loop header
LB: loop body
LE: loop exit
PB: predicated region body
PF: predicated region fallthrough
CT: control target
= control target key end

     0   :  { %14 = vsyncpa [#allocation3], 0  ;;  %s1944_s0 = inlined_call_operand.hbm [shape: bf16[8,8,128], index: 0, kind: input, shape index: {}]   ;;  %s1945_s1 = inlined_call_operand.hbm [shape: f32[8,128], index: 1, kind: input, shape index: {}]   ;;  %s1946_s2 = inlined_call_operand.hbm [shape: s32[8,8], index: 2, kind: input, shape index: {}]   ;;  %s1947_s3 = inlined_call_operand.hbm [shape: bf16[128,128], index: 3, kind: input, shape index: {}]   ;;  %s1948_s4 = inlined_call_operand.hbm [shape: f32[128,128], index: 4, kind: input, shape index: {}]   ;;  %s1949_s5 = inlined_call_operand.vmem [shape: f32[1,128], index: 5, kind: input, shape index: {}]   ;;  %s1950_s6 = inlined_call_operand.vmem [shape: f32[1,128], index: 6, kind: input, shape index: {}]   ;;  %s1951_s7 = inlined_call_operand.hbm [shape: bf16[128,128], index: 7, kind: input, shape index: {}]   ;;  %s1952_s8 = inlined_call_operand.hbm [shape: bf16[128,128], index: 8, kind: input, shape index: {}]   ;;  %s1953_s9 = inlined_call_operand.hbm [shape: f32[8,128], index: 9, kind: output, shape index: {}]  }
   0x1   :  { %15 = vsyncpa [#allocation6], 0 }
   0x2   :  { %16 = vsyncpa [#allocation9], 0 }
   0x3   :  { %17 = vsyncpa [#allocation12], 0 }
   0x4   :  { %18 = vsyncpa [#allocation4], 0  ;;  %s1633_s30 = smov [#allocation5]  }
   0x5   :  { %s37_s10 = sshll.u32 %s1633_s30, 4  ;;  %s38_s10 = int_to_ptr.vmem [resolvable:$true] %s37_s10 }
   0x6   :  { %s1471_s11 = scalar_lea.vmem %s38_s10, 128  ;;  %p1476_p1 = scmp.lt.s32.totalorder %s38_s10, %s38_s10 }
   0x7   :  { %p1472_p0 = scmp.ne.s32.totalorder %s38_s10, %s1471_s11  ;;  %p1477_p2 = scmp.lt.s32.totalorder %s1471_s11, %s1471_s11 }
   0x9   :  { %p1478_p3 = por %p1477_p2, %p1476_p1 }
   0xb   :  { %p1479_p4 = pnand %p1478_p3, %p1472_p0 }
   0xd   :  { %1482 = shalt.err (!%p1479_p4)
}
   0xe   :  { %40 = dma.hbm_to_vmem [thread:$0]  %s1945_s1, 128, %s38_s10, [#allocation6]  }
   0xf   :  { %s1634_s14 = smov [#allocation8]   ;;  %s1635_s16 = smov [#allocation11]  }
  0x10   :  { %s56_s15 = sshll.u32 %s1634_s14, 4  ;;  %s84_s17 = sshll.u32 %s1635_s16, 4  ;;  %s57_s15 = int_to_ptr.vmem [resolvable:$true] %s56_s15  ;;  %s85_s17 = int_to_ptr.vmem [resolvable:$true] %s84_s17 }
  0x11   :  { %s1491_s18 = scalar_lea.vmem %s57_s15, 1024  ;;  %p1496_p6 = scmp.lt.s32.totalorder %s57_s15, %s57_s15 }
  0x12   :  { %p1492_p5 = scmp.ne.s32.totalorder %s57_s15, %s1491_s18  ;;  %p1497_p7 = scmp.lt.s32.totalorder %s1491_s18, %s1491_s18 }
  0x14   :  { %p1498_p8 = por %p1497_p7, %p1496_p6 }
  0x16   :  { %p1499_p9 = pnand %p1498_p8, %p1492_p5 }
  0x18   :  { %1502 = shalt.err (!%p1499_p9)
}
  0x19   :  { %s1636_s19 = smov 64   ;;  %s1637_s20 = smov 4  }
  0x1a   :  { %62 = dma.hbm_to_vmem [thread:$0]  %s1947_s3, 1024, %s57_s15, [#allocation9], %s1636_s19, %s1636_s19, %s1637_s20  }
  0x1b   :  { %s1511_s1 = scalar_lea.vmem %s85_s17, 1024  ;;  %p1516_p11 = scmp.lt.s32.totalorder %s85_s17, %s85_s17 }
  0x1c   :  { %p1512_p10 = scmp.ne.s32.totalorder %s85_s17, %s1511_s1  ;;  %p1517_p12 = scmp.lt.s32.totalorder %s1511_s1, %s1511_s1 }
  0x1e   :  { %p1518_p13 = por %p1517_p12, %p1516_p11 }
  0x20   :  { %p1519_p0 = pnand %p1518_p13, %p1512_p10 }
  0x22   :  { %1522 = shalt.err (!%p1519_p0)
}
  0x23   :  { %90 = dma.hbm_to_vmem [thread:$0]  %s1951_s7, 1024, %s85_s17, [#allocation12], %s1636_s19, %s1636_s19, %s1637_s20  }
  0x24   :  { %s1638_s25 = smov [#allocation2]   ;;  %s1639_s27 = smov [#allocation7]  }
  0x25   :  { %s24_s26 = sshll.u32 %s1638_s25, 4  ;;  %s47_s3 = sshll.u32 %s1639_s27, 4  ;;  %s25_s26 = int_to_ptr.vmem [resolvable:$true] %s24_s26  ;;  %s48_s3 = int_to_ptr.vmem [resolvable:$true] %s47_s3 }
  0x26   :  { %s1531_s28 = scalar_lea.vmem %s25_s26, 512  ;;  %p1536_p2 = scmp.lt.s32.totalorder %s25_s26, %s25_s26 }
  0x27   :  { %p1532_p1 = scmp.ne.s32.totalorder %s25_s26, %s1531_s28  ;;  %p1537_p3 = scmp.lt.s32.totalorder %s1531_s28, %s1531_s28 }
  0x29   :  { %p1538_p4 = por %p1537_p3, %p1536_p2 }
  0x2b   :  { %p1539_p5 = pnand %p1538_p4, %p1532_p1 }
  0x2d   :  { %1542 = shalt.err (!%p1539_p5)
}
  0x2e   :  { %30 = dma.hbm_to_vmem [thread:$0]  %s1944_s0, 512, %s25_s26, [#allocation3], %s1636_s19, %s1636_s19, %s1637_s20  }
  0x2f   :  { %s1551_s7 = scalar_lea.vmem %s48_s3, 128  ;;  %p1556_p7 = scmp.lt.s32.totalorder %s48_s3, %s48_s3 }
  0x30   :  { %p1552_p6 = scmp.ne.s32.totalorder %s48_s3, %s1551_s7  ;;  %p1557_p8 = scmp.lt.s32.totalorder %s1551_s7, %s1551_s7 }
  0x32   :  { %p1558_p9 = por %p1557_p8, %p1556_p7 }
  0x34   :  { %p1559_p10 = pnand %p1558_p9, %p1552_p6 }
  0x36   :  { %1562 = shalt.err (!%p1559_p10)
}
  0x37   :  { %50 = dma.hbm_to_vmem [thread:$0]  %s1946_s2, 128, %s48_s3, [#allocation6]  }
  0x38   :  { %s1640_s12 = smov [#allocation10]  }
  0x39   :  { %s68_s13 = sshll.u32 %s1640_s12, 4  ;;  %s69_s13 = int_to_ptr.vmem [resolvable:$true] %s68_s13 }
  0x3a   :  { %s1571_s14 = scalar_lea.vmem %s69_s13, 2048  ;;  %p1576_p12 = scmp.lt.s32.totalorder %s69_s13, %s69_s13 }
  0x3b   :  { %p1572_p11 = scmp.ne.s32.totalorder %s69_s13, %s1571_s14  ;;  %p1577_p13 = scmp.lt.s32.totalorder %s1571_s14, %s1571_s14 }
  0x3d   :  { %p1578_p0 = por %p1577_p13, %p1576_p12 }
  0x3f   :  { %p1579_p1 = pnand %p1578_p0, %p1572_p11 }
  0x41   :  { %1582 = shalt.err (!%p1579_p1)
}
  0x42   :  { %s1641_s0 = smov 128   ;;  %s1642_s15 = smov 8  }
  0x43   :  { %74 = dma.hbm_to_vmem [thread:$0]  %s1948_s4, 2048, %s69_s13, [#allocation9], %s1641_s0, %s1641_s0, %s1642_s15  }
  0x44   :  { %s1643_s18 = smov [#allocation13]  }
  0x45   :  { %s96_s21 = sshll.u32 %s1643_s18, 4  ;;  %s97_s21 = int_to_ptr.vmem [resolvable:$true] %s96_s21 }
  0x46   :  { %s1591_s2 = scalar_lea.vmem %s97_s21, 1024  ;;  %p1596_p3 = scmp.lt.s32.totalorder %s97_s21, %s97_s21 }
  0x47   :  { %p1592_p2 = scmp.ne.s32.totalorder %s97_s21, %s1591_s2  ;;  %p1597_p4 = scmp.lt.s32.totalorder %s1591_s2, %s1591_s2 }
  0x49   :  { %p1598_p5 = por %p1597_p4, %p1596_p3 }
  0x4b   :  { %p1599_p6 = pnand %p1598_p5, %p1592_p2 }
  0x4d   :  { %1602 = shalt.err (!%p1599_p6)
}
  0x4e   :  { %102 = dma.hbm_to_vmem [thread:$0]  %s1952_s8, 1024, %s97_s21, [#allocation12], %s1636_s19, %s1636_s19, %s1637_s20  }
  0x4f   :  { %1623 = dma.done.wait [#allocation3], 512  }
  0x50   :  { %1624 = vsyncadd [#allocation3], 4294966784 }
  0x51   :  { %1625 = dma.done.wait [#allocation6], 256  }
  0x52   :  { %1626 = vsyncadd [#allocation6], 4294967040 }
  0x53   :  { %1627 = dma.done.wait [#allocation9], 3072  }
  0x54   :  { %1628 = vsyncadd [#allocation9], 4294964224 }
  0x55   :  { %1629 = dma.done.wait [#allocation12], 2048  }
  0x56   :  { %1630 = vsyncadd [#allocation12], 4294965248  ;;  %v1644_v0 = vmov 0.0   ;;  %vm1645_vm0 = vmmov 0   ;;  %v302_v1 = vld [vmem:[#allocation10 + $0x78] sm:$0xff]  ;;  %v301_v3 = vld [vmem:[#allocation10 + $0x70] sm:$0xff]  ;;  %v385_v32 = vlaneseq }
  0x57   :  { %1286 = vmatprep.subr.mxu1 %v1644_v0  ;;  %1318 = vmatprep.mubr.msk.f32.mxu1 %vm1645_vm0, %v1644_v0  ;;  %v1393_v2 = vld [vmem:[#allocation8 + $0x38] sm:$0xff]   ;;  %v300_v4 = vld [vmem:[#allocation10 + $0x68] sm:$0xff]  ;;  %v1394_v5 = vld [vmem:[#allocation8 + $0x30] sm:$0xff]   ;;  %v1646_v30 = vmov 1966171168   ;;  %vm559_vm1 = vcmask 1041409  }
  0x58   :  { %1287 = vmatpush3.msra.mxu1 %v302_v1  ;;  %1262 = vmatprep.subr.bf16.mxu0 %v1393_v2  ;;  %v299_v6 = vld [vmem:[#allocation10 + $0x60] sm:$0xff]  ;;  %v1395_v7 = vld [vmem:[#allocation8 + $0x28] sm:$0xff]   ;;  %v298_v8 = vld [vmem:[#allocation10 + $0x58] sm:$0xff]  ;;  %v383_v31 = vunpack.c.l.s4 %v1646_v30  ;;  %v1779_v34 = vshrl.u32 %v385_v32, 7  ;;  %vm561_vm2 = vcmask 1042434   ;;  %vm563_vm3 = vcmask 1043459  }
  0x59   :  { %1288 = vmatprep.subr.mxu1 %v1644_v0  ;;  %1263 = vmatpush3.bf16.msra.mxu0 %v1393_v2  ;;  %v297_v9 = vld [vmem:[#allocation10 + $0x50] sm:$0xff]  ;;  %v1396_v10 = vld [vmem:[#allocation8 + $0x20] sm:$0xff]   ;;  %v296_v11 = vld [vmem:[#allocation10 + $0x48] sm:$0xff]  ;;  %vm565_vm4 = vcmask 1044484   ;;  %vm567_vm5 = vcmask 1045509   ;;  %vm569_vm6 = vcmask 1046534  }
  0x5a   :  { %1289 = vmatpush3.msra.mxu1 %v301_v3  ;;  %1264 = vmatprep.subr.bf16.mxu0 %v1394_v5  ;;  %v295_v12 = vld [vmem:[#allocation10 + $0x40] sm:$0xff]  ;;  %v1397_v13 = vld [vmem:[#allocation8 + $0x18] sm:$0xff]   ;;  %v1748_v14 = vld [vmem:[#allocation2] sm:$0xff]   ;;  %v384_v33 = vunpack.c.0.s8 %v383_v31  ;;  %v1786_v43 = vsub.s32 0, %v1779_v34  ;;  %vm571_vm7 = vcmask 1047559   ;;  %vm574_vm8 = vcmask 64512  }
  0x5b   :  { %1290 = vmatprep.subr.mxu1 %v1644_v0  ;;  %v294_v15 = vld [vmem:[#allocation10 + $0x38] sm:$0xff]  ;;  %v293_v16 = vld [vmem:[#allocation10 + $0x30] sm:$0xff]  ;;  %v292_v18 = vld [vmem:[#allocation10 + $0x28] sm:$0xff]  ;;  %1278 = vmatprep.mubr.bf16.mxu0 %v1748_v14 }
  0x5c   :  { %1291 = vmatpush3.msra.mxu1 %v300_v4  ;;  %v1398_v17 = vld [vmem:[#allocation8 + $0x10] sm:$0xff]   ;;  %v291_v19 = vld [vmem:[#allocation10 + $0x20] sm:$0xff]  ;;  %v1399_v20 = vld [vmem:[#allocation8 + $0x8] sm:$0xff]   ;;  %v387_v36 = vsub.s32 %v384_v33, %v1779_v34 }
  0x5d   :  { %1292 = vmatprep.subr.mxu1 %v1644_v0  ;;  %1265 = vmatpush3.bf16.msra.mxu0 %v1394_v5  ;;  %v290_v21 = vld [vmem:[#allocation10 + $0x18] sm:$0xff]  ;;  %v289_v22 = vld [vmem:[#allocation10 + $0x10] sm:$0xff]  ;;  %v1400_v23 = vld [vmem:[#allocation8] sm:$0xff]  }
  0x5e   :  { %1293 = vmatpush3.msra.mxu1 %v299_v6  ;;  %1266 = vmatprep.subr.bf16.mxu0 %v1395_v7  ;;  %v288_v24 = vld [vmem:[#allocation10 + $0x8] sm:$0xff]  ;;  %v287_v25 = vld [vmem:[#allocation10] sm:$0xff]  ;;  %v1759_v26 = vld [vmem:[#allocation2 + $0x8] sm:$0xff]  }
  0x5f   :  { %1294 = vmatprep.subr.mxu1 %v1644_v0  ;;  %v1761_v27 = vld [vmem:[#allocation5] sm:$0xff]  ;;  %v1763_v28 = vld [vmem:[#allocation2 + $0x10] sm:$0xff]   ;;  %v1773_v29 = vld [vmem:[#allocation2 + $0x18] sm:$0xff]  }
  0x60   :  { %1295 = vmatpush3.msra.mxu1 %v298_v8  ;;  %v1197_v35 = vld [vmem:[%s1949_s5] ss:$0 sm:$0xff] }
  0x61   :  { %1296 = vmatprep.subr.mxu1 %v1644_v0  ;;  %1267 = vmatpush3.bf16.msra.mxu0 %v1395_v7 }
  0x62   :  { %1297 = vmatpush3.msra.mxu1 %v297_v9  ;;  %1268 = vmatprep.subr.bf16.mxu0 %v1396_v10 }
  0x63   :  { %1298 = vmatprep.subr.mxu1 %v1644_v0 }
  0x64   :  { %1299 = vmatpush3.msra.mxu1 %v296_v11 }
  0x65   :  { %1300 = vmatprep.subr.mxu1 %v1644_v0  ;;  %1269 = vmatpush3.bf16.msra.mxu0 %v1396_v10 }
  0x66   :  { %1301 = vmatpush3.msra.mxu1 %v295_v12  ;;  %1270 = vmatprep.subr.bf16.mxu0 %v1397_v13 }
  0x67   :  { %1302 = vmatprep.subr.mxu1 %v1644_v0 }
  0x68   :  { %1303 = vmatpush3.msra.mxu1 %v294_v15 }
  0x69   :  { %1304 = vmatprep.subr.mxu1 %v1644_v0  ;;  %1271 = vmatpush3.bf16.msra.mxu0 %v1397_v13 }
  0x6a   :  { %1305 = vmatpush3.msra.mxu1 %v293_v16  ;;  %1272 = vmatprep.subr.bf16.mxu0 %v1398_v17  ;;  %v1198_v16 = vld [vmem:[%s1950_s6] ss:$0 sm:$0xff]  ;;  %s1655_s6 = smov [#allocation14]  }
  0x6b   :  { %1306 = vmatprep.subr.mxu1 %v1644_v0  ;;  %s1173_s20 = sshll.u32 %s1655_s6, 4  ;;  %s1174_s20 = int_to_ptr.vmem [resolvable:$true] %s1173_s20 }
  0x6c   :  { %1307 = vmatpush3.msra.mxu1 %v292_v18  ;;  %s1603_s23 = scalar_lea.vmem %s1174_s20, 128  ;;  %p1608_p8 = scmp.lt.s32.totalorder %s1174_s20, %s1174_s20 }
  0x6d   :  { %1308 = vmatprep.subr.mxu1 %v1644_v0  ;;  %1273 = vmatpush3.bf16.msra.mxu0 %v1398_v17  ;;  %p1604_p7 = scmp.ne.s32.totalorder %s1174_s20, %s1603_s23  ;;  %p1609_p9 = scmp.lt.s32.totalorder %s1603_s23, %s1603_s23 }
  0x6e   :  { %1309 = vmatpush3.msra.mxu1 %v291_v19  ;;  %1274 = vmatprep.subr.bf16.mxu0 %v1399_v20 }
  0x6f   :  { %1310 = vmatprep.subr.mxu1 %v1644_v0  ;;  %p1610_p10 = por %p1609_p9, %p1608_p8 }
  0x70   :  { %1311 = vmatpush3.msra.mxu1 %v290_v21 }
  0x71   :  { %1312 = vmatprep.subr.mxu1 %v1644_v0  ;;  %1275 = vmatpush3.bf16.msra.mxu0 %v1399_v20  ;;  %p1611_p11 = pnand %p1610_p10, %p1604_p7 }
  0x72   :  { %1313 = vmatpush3.msra.mxu1 %v289_v22  ;;  %1276 = vmatprep.subr.bf16.mxu0 %v1400_v23 }
  0x73   :  { %1314 = vmatprep.subr.mxu1 %v1644_v0 }
  0x74   :  { %1315 = vmatpush3.msra.mxu1 %v288_v24 }
  0x75   :  { %1316 = vmatprep.subr.mxu1 %v1644_v0  ;;  %1277 = vmatpush3.bf16.msra.mxu0 %v1400_v23 }
  0x76   :  { %1317 = vmatpush3.msra.mxu1 %v287_v25  ;;  %1321 = vmatprep.subr.bf16.mxu0 %v1644_v0 }
  0x77   :  { %1319 = vmatmul.mubr.f32.vlgmr.msra.gmra.mxu1 %v1761_v27  ;;  %1341 = vmatprep.subr.bf16.mxu1 %v1644_v0 }
  0x78   :  { %1357 = vmatprep.mubr.msk.bf16.mxu1 %vm1645_vm0, %v1644_v0  ;;  %1279 = vmatmul.mubr.bf16.vlgmr.msra.gmra.mxu0 %v1759_v26 }
  0x79   :  { %1282 = vmatprep.mubr.bf16.mxu0 %v1763_v28 }
  0x80   :  { %1283 = vmatmul.mubr.bf16.gmra.mxu0 %v1773_v29 }
  0x81   :  { %1337 = vmatprep.mubr.msk.bf16.mxu0 %vm1645_vm0, %v1644_v0 }
 0x137   :  { %v376_v37 = vpop.f32.mrf.mxu1 }
 0x138   :  { %v377_v38 = vadd.f32 %v1197_v35, %v376_v37  ;;  %v1280_v42 = vpop.f32.mrf.mxu0 }
 0x139   :  { %v1320_v39 = vpop.f32.mrf.mxu1 }
 0x13a   :  { %v381_v40 = vcombine.high %v377_v38, %v377_v38  ;;  %v388_v41 = vrot.slane %v377_v38, %v387_v36  ;;  %v256_v47 = vpop.f32.mrf.mxu0  ;;  %v1800_v39 = vand.u32 127, %v385_v32 }
 0x13c   :  { %v395_v44 = vrot.slane %v381_v40, %v387_v36  ;;  %v396_v45 = vcombine.high %v388_v41, %v388_v41  ;;  %v404_v46 = vrot.slane %v388_v41, %v387_v36  ;;  %v1281_v51 = vpop.f32.mrf.mxu0  ;;  %v1804_v41 = vsub.s32 %v1800_v39, %v1779_v34 }
 0x13d   :  { %vm1115_vm9 = vcmp.ge.s32.totalorder %v1800_v39, 64 }
 0x13e   :  { %v397_v48 = vcombine.high %v395_v44, %v395_v44  ;;  %v426_v49 = vcombine.high %v404_v46, %v404_v46  ;;  %v433_v50 = vrot.slane %v404_v46, %v1786_v43  ;;  %v418_v52 = vrot.slane %v396_v45, %v387_v36  ;;  %v259_v57 = vpop.f32.mrf.mxu0 }
 0x13f   :  { %v411_v53 = vrot.slane %v395_v44, %v387_v36 }
 0x140   :  { %v441_v54 = vrot.slane %v426_v49, %v1786_v43  ;;  %v470_v55 = vadd.f32 %v433_v50, %v256_v47  ;;  %v428_v56 = vcombine.high %v418_v52, %v418_v52  ;;  %v437_v58 = vrot.slane %v418_v52, %v1786_v43  ;;  %v1284_v1 = vpop.f32.mrf.mxu0 }
 0x141   :  { %v427_v59 = vcombine.high %v411_v53, %v411_v53  ;;  %v425_v60 = vrot.slane %v397_v48, %v387_v36  ;;  %v449_v2 = vrot.slane %v411_v53, %v1786_v43 }
 0x142   :  { %v472_v61 = vadd.f32 %v1280_v42, %v441_v54  ;;  %1425 = vtanh.f32 %v470_v55  ;;  %v445_v62 = vrot.slane %v428_v56, %v1786_v43  ;;  %v471_v63 = vadd.f32 %v437_v58, %v259_v57  ;;  %v272_v6 = vpop.f32.mrf.mxu0 }
 0x143   :  { %v429_v3 = vcombine.high %v425_v60, %v425_v60  ;;  %v457_v5 = vrot.slane %v427_v59, %v1786_v43  ;;  %v474_v7 = vadd.f32 %v449_v2, %v272_v6  ;;  %v453_v10 = vrot.slane %v425_v60, %v1786_v43 }
 0x144   :  { %1427 = vtanh.f32 %v472_v61  ;;  %v473_v4 = vadd.f32 %v1281_v51, %v445_v62  ;;  %v1285_v8 = vpop.f32.mrf.mxu0  ;;  %v1647_v2 = vmov 0  }
 0x145   :  { %1429 = vtanh.f32 %v471_v63  ;;  %v461_v9 = vrot.slane %v429_v3, %v1786_v43  ;;  %v476_v11 = vadd.f32 %v1284_v1, %v457_v5  ;;  %1385 = vset.pattern.permute.xlu0 %v1647_v2  ;;  %1384 = vset.pattern.permute.xlu1 %v1647_v2  ;;  %v585_v3 = vsub.s32 1, %v1779_v34 }
 0x146   :  { %1431 = vtanh.f32 %v473_v4  ;;  %v275_v12 = vpop.f32.mrf.mxu0  ;;  %v589_v4 = vsub.s32 2, %v1779_v34  ;;  %v593_v5 = vsub.s32 3, %v1779_v34 }
 0x147   :  { %1433 = vtanh.f32 %v474_v7  ;;  %v475_v13 = vadd.f32 %v453_v10, %v275_v12  ;;  %v477_v15 = vadd.f32 %v1285_v8, %v461_v9  ;;  %v597_v10 = vsub.s32 4, %v1779_v34 }
 0x149   :  { %1435 = vtanh.f32 %v475_v13 }
 0x14a   :  { %1437 = vtanh.f32 %v476_v11 }
 0x14b   :  { %1439 = vtanh.f32 %v477_v15 }
 0x14f   :  { %v1426_v17 = vpop.eup %1425 }
 0x150   :  { %v493_v18 = vmul.f32 %v1426_v17, %v1198_v16 }
 0x151   :  { %v1428_v19 = vpop.eup %1427 }
 0x152   :  { %v1430_v20 = vpop.eup %1429  ;;  %501 = vadd.xlane.f32.xlu0 %v493_v18  ;;  %v495_v21 = vmul.f32 %v1428_v19, %v1198_v16  ;;  %v601_v18 = vsub.s32 5, %v1779_v34 }
 0x153   :  { %v1432_v22 = vpop.eup %1431  ;;  %v494_v23 = vmul.f32 %v1430_v20, %v1198_v16 }
 0x154   :  { %505 = vadd.xlane.f32.xlu1 %v495_v21  ;;  %v1434_v24 = vpop.eup %1433  ;;  %v496_v25 = vmul.f32 %v1432_v22, %v1198_v16  ;;  %v605_v22 = vsub.s32 6, %v1779_v34 }
 0x155   :  { %v497_v31 = vmul.f32 %v1434_v24, %v1198_v16 }
 0x156   :  { %503 = vadd.xlane.f32.xlu0 %v494_v23  ;;  %v1436_v30 = vpop.eup %1435 }
 0x157   :  { %v1438_v33 = vpop.eup %1437  ;;  %v498_v35 = vmul.f32 %v1436_v30, %v1198_v16  ;;  %v609_v30 = vsub.s32 7, %v1779_v34  ;;  %v1412_v34 = vld [vmem:[#allocation13 + $0x18] sm:$0xff]  }
 0x158   :  { %507 = vadd.xlane.f32.xlu1 %v496_v25  ;;  %v1440_v36 = vpop.eup %1439  ;;  %v499_v37 = vmul.f32 %v1438_v33, %v1198_v16 }
 0x159   :  { %v500_v38 = vmul.f32 %v1440_v36, %v1198_v16 }
 0x15a   :  { %509 = vadd.xlane.f32.xlu0 %v497_v31 }
 0x15c   :  { %511 = vadd.xlane.f32.xlu1 %v498_v35 }
 0x15e   :  { %513 = vadd.xlane.f32.xlu0 %v499_v37 }
 0x160   :  { %515 = vadd.xlane.f32.xlu1 %v500_v38 }
 0x1db   :  { %v502_v40 = vpop.xlane.xlu0 %501 }
 0x1dc   :  { %v530_v45 = vrot.slane %v502_v40, %v1804_v41 }
 0x1dd   :  { %v506_v42 = vpop.xlane.xlu1 %505 }
 0x1de   :  { %v538_v47 = vrot.slane %v506_v42, %v1804_v41 }
 0x1df   :  { %v504_v44 = vpop.xlane.xlu0 %503 }
 0x1e0   :  { %v534_v46 = vrot.slane %v504_v44, %v1804_v41 }
 0x1e1   :  { %v508_v48 = vpop.xlane.xlu1 %507 }
 0x1e2   :  { %v560_v32 = vsel %vm559_vm1, %v534_v46, %v530_v45  ;;  %v542_v49 = vrot.slane %v508_v48, %v1804_v41 }
 0x1e3   :  { %v562_v50 = vsel %vm561_vm2, %v538_v47, %v560_v32  ;;  %v510_v51 = vpop.xlane.xlu0 %509 }
 0x1e4   :  { %v564_v52 = vsel %vm563_vm3, %v542_v49, %v562_v50  ;;  %v546_v53 = vrot.slane %v510_v51, %v1804_v41 }
 0x1e5   :  { %v512_v54 = vpop.xlane.xlu1 %511 }
 0x1e6   :  { %v566_v55 = vsel %vm565_vm4, %v546_v53, %v564_v52  ;;  %v550_v56 = vrot.slane %v512_v54, %v1804_v41 }
 0x1e7   :  { %v514_v57 = vpop.xlane.xlu0 %513 }
 0x1e8   :  { %v554_v58 = vrot.slane %v514_v57, %v1804_v41  ;;  %v568_v59 = vsel %vm567_vm5, %v550_v56, %v566_v55 }
 0x1e9   :  { %v516_v60 = vpop.xlane.xlu1 %515 }
 0x1ea   :  { %v558_v61 = vrot.slane %v516_v60, %v1804_v41  ;;  %v570_v62 = vsel %vm569_vm6, %v554_v58, %v568_v59 }
 0x1ec   :  { %v572_v63 = vsel %vm571_vm7, %v558_v61, %v570_v62 }
 0x1ed   :  { %v575_v1 = vsel %vm574_vm8, %v572_v63, -inf }
 0x1ee   :  { %576 = vmax.xlane.f32.xlu0 %v575_v1 }
 0x277   :  { %v577_v6 = vpop.xlane.xlu0 %576 }
 0x278   :  { %v582_v7 = vrot.slane %v577_v6, %v1786_v43  ;;  %v586_v8 = vrot.slane %v577_v6, %v585_v3  ;;  %v590_v9 = vrot.slane %v577_v6, %v589_v4  ;;  %v594_v11 = vrot.slane %v577_v6, %v593_v5 }
 0x279   :  { %v598_v19 = vrot.slane %v577_v6, %v597_v10  ;;  %v602_v23 = vrot.slane %v577_v6, %v601_v18  ;;  %v606_v31 = vrot.slane %v577_v6, %v605_v22  ;;  %v610_v36 = vrot.slane %v577_v6, %v609_v30 }
 0x27a   :  { %v619_v12 = vsub.f32 %v502_v40, %v582_v7  ;;  %v620_v13 = vsub.f32 %v504_v44, %v586_v8  ;;  %v621_v15 = vsub.f32 %v506_v42, %v590_v9  ;;  %v622_v20 = vsub.f32 %v508_v48, %v594_v11 }
 0x27b   :  { %v623_v24 = vsub.f32 %v510_v51, %v598_v19  ;;  %v624_v33 = vsub.f32 %v512_v54, %v602_v23  ;;  %v625_v37 = vsub.f32 %v514_v57, %v606_v31  ;;  %v626_v44 = vsub.f32 %v516_v60, %v610_v36  ;;  %v1872_v19 = vld [vmem:[#allocation7] sm:$0xff] }
 0x27c   :  { %v627_v16 = vmul.f32 1.442695, %v619_v12  ;;  %v629_v17 = vmul.f32 1.442695, %v620_v13  ;;  %v631_v21 = vmul.f32 1.442695, %v621_v15 }
 0x27d   :  { %v633_v25 = vmul.f32 1.442695, %v622_v20  ;;  %v635_v35 = vmul.f32 1.442695, %v623_v24  ;;  %v637_v38 = vmul.f32 1.442695, %v624_v33 }
 0x27e   :  { %1441 = vpow2.f32 %v627_v16  ;;  %v639_v45 = vmul.f32 1.442695, %v625_v37  ;;  %v641_v47 = vmul.f32 1.442695, %v626_v44  ;;  %v1648_v20 = vmov 3  }
 0x27f   :  { %1443 = vpow2.f32 %v629_v17 }
 0x280   :  { %1445 = vpow2.f32 %v631_v21  ;;  %v1649_v21 = vmov 5  }
 0x281   :  { %1447 = vpow2.f32 %v633_v25 }
 0x282   :  { %1449 = vpow2.f32 %v635_v35 }
 0x283   :  { %1451 = vpow2.f32 %v637_v38 }
 0x284   :  { %1453 = vpow2.f32 %v639_v45 }
 0x285   :  { %1455 = vpow2.f32 %v641_v47 }
 0x28b   :  { %v1442_v40 = vpop.eup %1441 }
 0x28c   :  { %v1844_v42 = vpop.eup %1443  ;;  %652 = vperm.xlu1 %1384, %v1442_v40  }
 0x28d   :  { %655 = vperm.xlu0 %1385, %v1844_v42   ;;  %v1446_v46 = vpop.eup %1445 }
 0x28e   :  { %v1448_v48 = vpop.eup %1447 }
 0x28f   :  { %v1450_v32 = vpop.eup %1449 }
 0x290   :  { %658 = vperm.xlu1 %1384, %v1446_v46   ;;  %v1847_v49 = vpop.eup %1451 }
 0x291   :  { %v1850_v50 = vpop.eup %1453 }
 0x292   :  { %v1853_v51 = vpop.eup %1455 }
 0x294   :  { %661 = vperm.xlu1 %1384, %v1448_v48  }
 0x298   :  { %664 = vperm.xlu1 %1384, %v1450_v32  }
 0x29c   :  { %667 = vperm.xlu1 %1384, %v1847_v49  }
 0x2a0   :  { %670 = vperm.xlu1 %1384, %v1850_v50  }
 0x2a4   :  { %673 = vperm.xlu1 %1384, %v1853_v51  }
 0x307   :  { %v653_v52 = vpop.permute.xlu1 %652 }
 0x308   :  { %v656_v56 = vpop.permute.xlu0 %655  ;;  %v678_v59 = vrot.slane %v653_v52, %v1804_v41  ;;  %v1415_v52 = vld [vmem:[#allocation11 + $0x18] sm:$0xff]  }
 0x309   :  { %v682_v58 = vrot.slane %v656_v56, %v1804_v41  ;;  %v1418_v56 = vld [vmem:[#allocation13] sm:$0xff]  }
 0x30b   :  { %v659_v53 = vpop.permute.xlu1 %658  ;;  %v707_v1 = vsel %vm559_vm1, %v682_v58, %v678_v59  ;;  %v896_v58 = vpack.c.bf16 %v1761_v27, %v1761_v27  ;;  %v1653_v59 = vmov 4   ;;  %v769_v27 = vunpack.c.h.bf16 %v1748_v14 }
 0x30c   :  { %v686_v60 = vrot.slane %v659_v53, %v1804_v41  ;;  %v1652_v53 = vmov 2  }
 0x30e   :  { %v708_v6 = vsel %vm561_vm2, %v686_v60, %v707_v1  ;;  %v1420_v60 = vld [vmem:[#allocation11] sm:$0xff]  }
 0x30f   :  { %v662_v54 = vpop.permute.xlu1 %661 }
 0x310   :  { %v690_v61 = vrot.slane %v662_v54, %v1804_v41  ;;  %v1416_v54 = vld [vmem:[#allocation13 + $0x8] sm:$0xff]  }
 0x312   :  { %v709_v8 = vsel %vm563_vm3, %v690_v61, %v708_v6  ;;  %v1654_v61 = vmov 7   ;;  %v770_v6 = vunpack.c.l.bf16 %v1759_v26 }
 0x313   :  { %v665_v55 = vpop.permute.xlu1 %664 }
 0x314   :  { %v694_v62 = vrot.slane %v665_v55, %v1804_v41  ;;  %v1417_v55 = vld [vmem:[#allocation11 + $0x10] sm:$0xff]  }
 0x316   :  { %v710_v9 = vsel %vm565_vm4, %v694_v62, %v709_v8 }
 0x317   :  { %v668_v57 = vpop.permute.xlu1 %667 }
 0x318   :  { %v698_v2 = vrot.slane %v668_v57, %v1804_v41  ;;  %v1419_v57 = vld [vmem:[#allocation11 + $0x8] sm:$0xff]  }
 0x31a   :  { %v711_v12 = vsel %vm567_vm5, %v698_v2, %v710_v9 }
 0x31b   :  { %v671_v63 = vpop.permute.xlu1 %670 }
 0x31c   :  { %v702_v7 = vrot.slane %v671_v63, %v1804_v41  ;;  %v768_v63 = vunpack.c.l.bf16 %v1748_v14 }
 0x31e   :  { %v712_v15 = vsel %vm569_vm6, %v702_v7, %v711_v12 }
 0x31f   :  { %v674_v11 = vpop.permute.xlu1 %673 }
 0x320   :  { %v706_v13 = vrot.slane %v674_v11, %v1804_v41  ;;  %v1650_v41 = vmov 6  }
 0x322   :  { %v713_v16 = vsel %vm571_vm7, %v706_v13, %v712_v15 }
 0x323   :  { %v715_v17 = vsel %vm574_vm8, %v713_v16, 0.0 }
 0x324   :  { %716 = vadd.xlane.f32.xlu1 %v715_v17 }
 0x335   :  { %1117 = vperm.xlu1 %1384, %v1872_v19  }
 0x339   :  { %1388 = vset.pattern.permute.xlu1 %v1648_v20 }
 0x33a   :  { %1132 = vperm.xlu1 %1388, %v1872_v19  }
 0x33e   :  { %1390 = vset.pattern.permute.xlu1 %v1649_v21  ;;  %v772_v21 = vunpack.c.l.bf16 %v1763_v28 }
 0x33f   :  { %1142 = vperm.xlu1 %1390, %v1872_v19  }
 0x343   :  { %1391 = vset.pattern.permute.xlu1 %v1650_v41 }
 0x344   :  { %1147 = vperm.xlu1 %1391, %v1872_v19  }
 0x3ad   :  { %v717_v23 = vpop.xlane.xlu1 %716 }
 0x3ae   :  { %1457 = vrcp.f32 %v717_v23 }
 0x3bb   :  { %v1458_v24 = vpop.eup %1457 }
 0x3bc   :  { %v723_v25 = vrot.slane %v1458_v24, %v1786_v43  ;;  %v727_v33 = vrot.slane %v1458_v24, %v585_v3  ;;  %v731_v36 = vrot.slane %v1458_v24, %v589_v4  ;;  %v735_v38 = vrot.slane %v1458_v24, %v593_v5  ;;  %v1406_v4 = vld [vmem:[#allocation13 + $0x30] sm:$0xff]  }
 0x3bd   :  { %v739_v43 = vrot.slane %v1458_v24, %v597_v10  ;;  %v743_v3 = vrot.slane %v1458_v24, %v601_v18  ;;  %v747_v5 = vrot.slane %v1458_v24, %v605_v22  ;;  %v1408_v10 = vld [vmem:[#allocation13 + $0x28] sm:$0xff]   ;;  %v751_v18 = vrot.slane %v1458_v24, %v609_v30  ;;  %v1410_v22 = vld [vmem:[#allocation13 + $0x20] sm:$0xff]  }
 0x3be   :  { %v760_v31 = vmul.f32 %v1442_v40, %v723_v25  ;;  %v761_v35 = vmul.f32 %v1844_v42, %v727_v33  ;;  %v762_v37 = vmul.f32 %v1446_v46, %v731_v36  ;;  %v763_v44 = vmul.f32 %v1448_v48, %v735_v38  ;;  %v1405_v40 = vld [vmem:[#allocation13 + $0x38] sm:$0xff]   ;;  %v1409_v48 = vld [vmem:[#allocation11 + $0x30] sm:$0xff]   ;;  %v1413_v30 = vld [vmem:[#allocation11 + $0x20] sm:$0xff]  }
 0x3bf   :  { %v764_v45 = vmul.f32 %v1450_v32, %v739_v43  ;;  %1322 = vmatpush3.bf16.msra.mxu0 %v1405_v40  ;;  %v765_v42 = vmul.f32 %v1847_v49, %v743_v3  ;;  %v1407_v46 = vld [vmem:[#allocation11 + $0x38] sm:$0xff]   ;;  %v766_v47 = vmul.f32 %v1850_v50, %v747_v5  ;;  %v767_v32 = vmul.f32 %v1853_v51, %v751_v18  ;;  %v1411_v49 = vld [vmem:[#allocation11 + $0x28] sm:$0xff]   ;;  %v1414_v51 = vld [vmem:[#allocation13 + $0x10] sm:$0xff]  }
 0x3c0   :  { %778 = vperm.xlu0 %1385, %v760_v31   ;;  %1323 = vmatprep.subr.bf16.mxu0 %v1644_v0  ;;  %v1651_v50 = vmov 1   ;;  %v773_v25 = vunpack.c.h.bf16 %v1763_v28  ;;  %v774_v43 = vunpack.c.l.bf16 %v1773_v29  ;;  %v775_v18 = vunpack.c.h.bf16 %v1773_v29 }
 0x3c1   :  { %1342 = vmatpush3.bf16.msra.mxu1 %v1407_v46 }
 0x3c2   :  { %1343 = vmatprep.subr.bf16.mxu1 %v1644_v0 }
 0x3c3   :  { %1324 = vmatpush3.bf16.msra.mxu0 %v1406_v4 }
 0x3c4   :  { %783 = vperm.xlu0 %1385, %v761_v35   ;;  %1325 = vmatprep.subr.bf16.mxu0 %v1644_v0 }
 0x3c5   :  { %1344 = vmatpush3.bf16.msra.mxu1 %v1409_v48 }
 0x3c6   :  { %1345 = vmatprep.subr.bf16.mxu1 %v1644_v0 }
 0x3c7   :  { %1326 = vmatpush3.bf16.msra.mxu0 %v1408_v10 }
 0x3c8   :  { %788 = vperm.xlu0 %1385, %v762_v37   ;;  %1327 = vmatprep.subr.bf16.mxu0 %v1644_v0 }
 0x3c9   :  { %1346 = vmatpush3.bf16.msra.mxu1 %v1411_v49 }
 0x3ca   :  { %1347 = vmatprep.subr.bf16.mxu1 %v1644_v0 }
 0x3cb   :  { %1328 = vmatpush3.bf16.msra.mxu0 %v1410_v22 }
 0x3cc   :  { %793 = vperm.xlu0 %1385, %v763_v44   ;;  %1329 = vmatprep.subr.bf16.mxu0 %v1644_v0 }
 0x3cd   :  { %1348 = vmatpush3.bf16.msra.mxu1 %v1413_v30 }
 0x3ce   :  { %1349 = vmatprep.subr.bf16.mxu1 %v1644_v0 }
 0x3cf   :  { %1330 = vmatpush3.bf16.msra.mxu0 %v1412_v34 }
 0x3d0   :  { %798 = vperm.xlu0 %1385, %v764_v45   ;;  %1331 = vmatprep.subr.bf16.mxu0 %v1644_v0 }
 0x3d1   :  { %1350 = vmatpush3.bf16.msra.mxu1 %v1415_v52 }
 0x3d2   :  { %1351 = vmatprep.subr.bf16.mxu1 %v1644_v0 }
 0x3d3   :  { %1332 = vmatpush3.bf16.msra.mxu0 %v1414_v51 }
 0x3d4   :  { %803 = vperm.xlu0 %1385, %v765_v42   ;;  %1333 = vmatprep.subr.bf16.mxu0 %v1644_v0 }
 0x3d5   :  { %1352 = vmatpush3.bf16.msra.mxu1 %v1417_v55 }
 0x3d6   :  { %1353 = vmatprep.subr.bf16.mxu1 %v1644_v0 }
 0x3d7   :  { %1334 = vmatpush3.bf16.msra.mxu0 %v1416_v54 }
 0x3d8   :  { %808 = vperm.xlu0 %1385, %v766_v47   ;;  %1335 = vmatprep.subr.bf16.mxu0 %v1644_v0 }
 0x3d9   :  { %1354 = vmatpush3.bf16.msra.mxu1 %v1419_v57 }
 0x3da   :  { %1355 = vmatprep.subr.bf16.mxu1 %v1644_v0  ;;  %v771_v0 = vunpack.c.h.bf16 %v1759_v26 }
 0x3db   :  { %1336 = vmatpush3.bf16.msra.mxu0 %v1418_v56 }
 0x3dc   :  { %813 = vperm.xlu0 %1385, %v767_v32  }
 0x3dd   :  { %1356 = vmatpush3.bf16.msra.mxu1 %v1420_v60 }
 0x3de   :  { %1338 = vmatmul.mubr.bf16.vlgmr.msra.gmra.mxu0 %v896_v58 }
 0x3e0   :  { %1386 = vset.pattern.permute.xlu0 %v1651_v50 }
 0x3e1   :  { %1122 = vperm.xlu0 %1386, %v1872_v19  }
 0x3e5   :  { %1387 = vset.pattern.permute.xlu0 %v1652_v53 }
 0x3e6   :  { %1127 = vperm.xlu0 %1387, %v1872_v19  }
 0x3ea   :  { %1389 = vset.pattern.permute.xlu0 %v1653_v59 }
 0x3eb   :  { %1137 = vperm.xlu0 %1389, %v1872_v19  }
 0x3ef   :  { %1392 = vset.pattern.permute.xlu0 %v1654_v61 }
 0x3f0   :  { %1152 = vperm.xlu0 %1392, %v1872_v19  }
 0x43b   :  { %v779_v62 = vpop.permute.xlu0 %778 }
 0x43c   :  { %v816_v7 = vmul.f32 %v779_v62, %v768_v63 }
 0x43e   :  { %v824_v12 = vrot.slane %v816_v7, 4 }
 0x43f   :  { %v784_v1 = vpop.permute.xlu0 %783 }
 0x440   :  { %v817_v2 = vmul.f32 %v784_v1, %v769_v27  ;;  %v825_v19 = vadd.f32 %v824_v12, %v816_v7 }
 0x442   :  { %v830_v9 = vrot.slane %v817_v2, 4  ;;  %v826_v31 = vrot.slane %v825_v19, 2 }
 0x443   :  { %v789_v8 = vpop.permute.xlu0 %788 }
 0x444   :  { %v818_v11 = vmul.f32 %v789_v8, %v770_v6  ;;  %v831_v16 = vadd.f32 %v830_v9, %v817_v2  ;;  %v827_v40 = vadd.f32 %v826_v31, %v825_v19 }
 0x446   :  { %v836_v13 = vrot.slane %v818_v11, 4  ;;  %v832_v23 = vrot.slane %v831_v16, 2  ;;  %v828_v48 = vrot.slane %v827_v40, 1 }
 0x447   :  { %v794_v15 = vpop.permute.xlu0 %793 }
 0x448   :  { %v819_v17 = vmul.f32 %v794_v15, %v771_v0  ;;  %v837_v20 = vadd.f32 %v836_v13, %v818_v11  ;;  %v833_v38 = vadd.f32 %v832_v23, %v831_v16  ;;  %v829_v56 = vadd.f32 %v828_v48, %v827_v40 }
 0x44a   :  { %v842_v14 = vrot.slane %v819_v17, 4  ;;  %v838_v33 = vrot.slane %v837_v20, 2  ;;  %v834_v10 = vrot.slane %v833_v38, 1  ;;  %v872_v6 = vpack.c.bf16 %v829_v56, %v829_v56 }
 0x44b   :  { %v799_v41 = vpop.permute.xlu0 %798 }
 0x44c   :  { %v843_v24 = vadd.f32 %v842_v14, %v819_v17  ;;  %v820_v35 = vmul.f32 %v799_v41, %v772_v21  ;;  %v839_v45 = vadd.f32 %v838_v33, %v837_v20  ;;  %v835_v52 = vadd.f32 %v834_v10, %v833_v38 }
 0x44d   :  { %v1009_v17 = vunpack.c.l.b16 %v872_v6 }
 0x44e   :  { %v844_v36 = vrot.slane %v843_v24, 2  ;;  %v848_v26 = vrot.slane %v820_v35, 4  ;;  %v840_v22 = vrot.slane %v839_v45, 1  ;;  %v873_v29 = vpack.c.bf16 %v835_v52, %v835_v52 }
 0x44f   :  { %v804_v37 = vpop.permute.xlu0 %803 }
 0x450   :  { %v821_v44 = vmul.f32 %v804_v37, %v773_v25  ;;  %v849_v3 = vadd.f32 %v848_v26, %v820_v35  ;;  %v845_v4 = vadd.f32 %v844_v36, %v843_v24  ;;  %v841_v57 = vadd.f32 %v840_v22, %v839_v45 }
 0x451   :  { %v1010_v0 = vunpack.c.l.b16 %v873_v29 }
 0x452   :  { %v854_v42 = vrot.slane %v821_v44, 4  ;;  %v850_v5 = vrot.slane %v849_v3, 2  ;;  %v846_v49 = vrot.slane %v845_v4, 1  ;;  %v874_v2 = vpack.c.bf16 %v841_v57, %v841_v57 }
 0x453   :  { %v809_v46 = vpop.permute.xlu0 %808  ;;  %v1017_v41 = vsel %vm559_vm1, %v1010_v0, %v1009_v17 }
 0x454   :  { %v855_v47 = vadd.f32 %v854_v42, %v821_v44  ;;  %v822_v28 = vmul.f32 %v809_v46, %v774_v43  ;;  %v851_v32 = vadd.f32 %v850_v5, %v849_v3  ;;  %v847_v58 = vadd.f32 %v846_v49, %v845_v4  ;;  %v1118_v5 = vpop.permute.xlu1 %1117 }
 0x455   :  { %v1011_v16 = vunpack.c.l.b16 %v874_v2  ;;  %vm1119_vm10 = vcmp.eq.s32.totalorder %v1800_v39, %v1118_v5 }
 0x456   :  { %v856_v34 = vrot.slane %v855_v47, 2  ;;  %v860_v30 = vrot.slane %v822_v28, 4  ;;  %v852_v50 = vrot.slane %v851_v32, 1  ;;  %v875_v7 = vpack.c.bf16 %v847_v58, %v847_v58  ;;  %vm1120_vm13 = vmor %vm1115_vm9, %vm1119_vm10 }
 0x457   :  { %v814_v51 = vpop.permute.xlu0 %813  ;;  %v1018_v25 = vsel %vm561_vm2, %v1011_v16, %v1017_v41 }
 0x458   :  { %v857_v53 = vadd.f32 %v856_v34, %v855_v47  ;;  %v861_v54 = vadd.f32 %v860_v30, %v822_v28  ;;  %v823_v55 = vmul.f32 %v814_v51, %v775_v18  ;;  %v853_v62 = vadd.f32 %v852_v50, %v851_v32  ;;  %v1133_v46 = vpop.permute.xlu1 %1132 }
 0x459   :  { %v1012_v19 = vunpack.c.l.b16 %v875_v7  ;;  %vm1134_vm15 = vcmp.eq.s32.totalorder %v1800_v39, %v1133_v46 }
 0x45a   :  { %v858_v59 = vrot.slane %v857_v53, 1  ;;  %v862_v60 = vrot.slane %v861_v54, 2  ;;  %v866_v61 = vrot.slane %v823_v55, 4  ;;  %v876_v11 = vpack.c.bf16 %v853_v62, %v853_v62 }
 0x45b   :  { %v1019_v33 = vsel %vm563_vm3, %v1012_v19, %v1018_v25 }
 0x45c   :  { %v859_v27 = vadd.f32 %v858_v59, %v857_v53  ;;  %v863_v63 = vadd.f32 %v862_v60, %v861_v54  ;;  %v867_v1 = vadd.f32 %v866_v61, %v823_v55  ;;  %v1013_v14 = vunpack.c.l.b16 %v876_v11  ;;  %v1123_v42 = vpop.permute.xlu0 %1122  ;;  %v1143_v47 = vpop.permute.xlu1 %1142 }
 0x45d   :  { %vm1124_vm11 = vcmp.eq.s32.totalorder %v1800_v39, %v1123_v42  ;;  %vm1144_vm3 = vcmp.eq.s32.totalorder %v1800_v39, %v1143_v47 }
 0x45e   :  { %v864_v8 = vrot.slane %v863_v63, 1  ;;  %v868_v9 = vrot.slane %v867_v1, 2  ;;  %v877_v12 = vpack.c.bf16 %v859_v27, %v859_v27  ;;  %v1020_v36 = vsel %vm565_vm4, %v1013_v14, %v1019_v33  ;;  %vm1125_vm14 = vmor %vm1120_vm13, %vm1124_vm11 }
 0x460   :  { %v865_v13 = vadd.f32 %v864_v8, %v863_v63  ;;  %v869_v15 = vadd.f32 %v868_v9, %v867_v1  ;;  %v1014_v23 = vunpack.c.l.b16 %v877_v12  ;;  %v1148_v18 = vpop.permute.xlu1 %1147 }
 0x461   :  { %v1128_v10 = vpop.permute.xlu0 %1127 }
 0x462   :  { %v878_v20 = vpack.c.bf16 %v865_v13, %v865_v13  ;;  %v870_v21 = vrot.slane %v869_v15, 1  ;;  %v1021_v26 = vsel %vm567_vm5, %v1014_v23, %v1020_v36  ;;  %vm1129_vm12 = vcmp.eq.s32.totalorder %v1800_v39, %v1128_v10 }
 0x463   :  { %vm1130_vm0 = vmor %vm1125_vm14, %vm1129_vm12 }
 0x464   :  { %v871_v24 = vadd.f32 %v870_v21, %v869_v15  ;;  %v1015_v31 = vunpack.c.l.b16 %v878_v20  ;;  %vm1135_vm2 = vmor %vm1130_vm0, %vm1134_vm15 }
 0x466   :  { %v879_v35 = vpack.c.bf16 %v871_v24, %v871_v24  ;;  %v1022_v38 = vsel %vm569_vm6, %v1015_v31, %v1021_v26  ;;  %v1138_v28 = vpop.permute.xlu0 %1137  ;;  %vm1149_vm6 = vcmp.eq.s32.totalorder %v1800_v39, %v1148_v18 }
 0x467   :  { %vm1139_vm1 = vcmp.eq.s32.totalorder %v1800_v39, %v1138_v28 }
 0x468   :  { %v1016_v37 = vunpack.c.l.b16 %v879_v35  ;;  %vm1140_vm4 = vmor %vm1135_vm2, %vm1139_vm1 }
 0x469   :  { %vm1145_vm5 = vmor %vm1140_vm4, %vm1144_vm3 }
 0x46a   :  { %v1023_v44 = vsel %vm571_vm7, %v1016_v37, %v1022_v38  ;;  %vm1150_vm8 = vmor %vm1145_vm5, %vm1149_vm6 }
 0x46b   :  { %v1024_v43 = vpack.c.b16 %v1023_v44, %v1023_v44  ;;  %v1153_v48 = vpop.permute.xlu0 %1152 }
 0x46c   :  { %vm1154_vm7 = vcmp.eq.s32.totalorder %v1800_v39, %v1153_v48 }
 0x46d   :  { %1358 = vmatmul.mubr.bf16.vlgmr.msra.gmra.mxu1 %v1024_v43  ;;  %vm1155_vm9 = vmor %vm1150_vm8, %vm1154_vm7 }
 0x49e   :  { %v995_v40 = vpop.f32.mrf.mxu0 }
 0x4a0   :  { %v1339_v45 = vpop.f32.mrf.mxu0 }
 0x4a2   :  { %v998_v3 = vpop.f32.mrf.mxu0 }
 0x4a4   :  { %v1340_v4 = vpop.f32.mrf.mxu0 }
 0x52d   :  { %v1108_v22 = vpop.f32.mrf.mxu1 }
 0x52e   :  { %v1109_v32 = vadd.f32 %v1108_v22, %v995_v40 }
 0x52f   :  { %v1359_v49 = vpop.f32.mrf.mxu1 }
 0x530   :  { %v1156_v34 = vsel %vm1155_vm9, -inf, %v1109_v32 }
 0x531   :  { %v1111_v30 = vpop.f32.mrf.mxu1  ;;  %1157 = vmax.xlane.f32.xlu1 %v1156_v34 }
 0x533   :  { %v1360_v50 = vpop.f32.mrf.mxu1 }
 0x5ba   :  { %v1158_v51 = vpop.xlane.xlu1 %1157 }
 0x5bb   :  { %v1159_v52 = vsub.f32 %v1156_v34, %v1158_v51 }
 0x5bd   :  { %v1160_v53 = vmul.f32 1.442695, %v1159_v52 }
 0x5bf   :  { %1459 = vpow2.f32 %v1160_v53 }
 0x5cc   :  { %v1460_v54 = vpop.eup %1459 }
 0x5cd   :  { %1162 = vadd.xlane.f32.xlu0 %v1460_v54 }
 0x656   :  { %v1163_v55 = vpop.xlane.xlu0 %1162 }
 0x657   :  { %1461 = vrcp.f32 %v1163_v55 }
 0x664   :  { %v1462_v39 = vpop.eup %1461 }
 0x665   :  { %v1165_v56 = vmul.f32 %v1462_v39, %v1460_v54 }
 0x667   :  { %1166 = vst [vmem:[#allocation14] sm:$0xff] %v1165_v56 }
 0x668   :  { %1614 = shalt.err (!%p1611_p11)
}
 0x669   :  { %1176 = dma.vmem_to_hbm [thread:$0]  %s1174_s20, 128, %s1953_s9, [#allocation4]  }
 0x66a   :  { %1631 = dma.done.wait [#allocation4], 128  }
 0x66b   :  { %1632 = vsyncadd [#allocation4], 4294967168 }
 0x66c   :  { %1180 = vsyncpa [#allocation3], 1 }
 0x66d   :  { %1181 = vsyncpa [#allocation6], 1 }
 0x66e   :  { %1182 = vsyncpa [#allocation9], 1 }
 0x66f   :  { %1183 = vsyncpa [#allocation12], 1 }
 0x670   :  { %1184 = vsyncpa [#allocation4], 1 }

</bundles_post_ra>
